<compile_context>
chip_gen: v5e
topology: v5e:2x2
jax: 0.10.0
libtpu: 0.0.40
codegen_flags: <defaults>
</compile_context>

<pallas_src>
import jax
import jax.numpy as jnp
from jax.experimental import pallas as pl
from jax.experimental.pallas import tpu as pltpu


# ---------------------------------------------------------------------------
# Fused Pallas kernel: linear0+relu -> LSTM (num_layers) -> proj -> softmax
# ---------------------------------------------------------------------------

def _make_fused_kernel(T, B, H, num_layers):
    """Kernel closure over the static shape parameters.

    Ref layout (all VMEM, whole-array blocks):
      x_ref      : [T*B, Din]   time-major flattened decoder input (f32)
      z_ref      : [B, Bn]      latent (f32)
      w0_ref     : [Bn, H]      linear0 weight, pre-transposed (f32)
      b0_ref     : [1, H]
      per layer l (3 refs): w_ih [Din_l, 4H] bf16, w_hh [H, 4H] bf16,
                            b    [1, 4H] f32  (= b_ih + b_hh)
      w_out_ref  : [H, V] bf16 (pre-transposed)
      b_out_ref  : [1, V] f32
      out_ref    : [B, T, V] f32
    """

    def kernel(*refs):
        x_ref, z_ref, w0_ref, b0_ref = refs[:4]
        layer_refs = refs[4:4 + 3 * num_layers]
        w_out_ref, b_out_ref, out_ref = refs[4 + 3 * num_layers:]

        f32, bf16 = jnp.float32, jnp.bfloat16
        V = b_out_ref.shape[-1]

        # h0 = relu(z @ w0 + b0); shared initial hidden state of every layer.
        h0 = jnp.maximum(
            jnp.dot(z_ref[...], w0_ref[...], preferred_element_type=f32)
            + b0_ref[...], 0.0)                                    # [B, H]
        c0 = jnp.zeros((B, H), f32)

        x_flat = x_ref[...].astype(bf16)                           # [T*B, Din]

        def run_layer(layer_in_bf, w_ih_ref, w_hh_ref, b_ref):
            # Hoisted input-to-hidden matmul + bias: ONE MXU call per layer,
            # outside the serial recurrence.
            gates_x = (jnp.dot(layer_in_bf, w_ih_ref[...],
                               preferred_element_type=f32)
                       + b_ref[...])                               # [T*B, 4H]
            w_hh = w_hh_ref[...]                                   # [H, 4H] bf16
            h, c = h0, c0
            hs = []
            for t in range(T):                                     # fully unrolled
                gates = (gates_x[t * B:(t + 1) * B, :]
                         + jnp.dot(h.astype(bf16), w_hh,
                                   preferred_element_type=f32))    # [B, 4H]
                # Full-width transcendentals (EUP), then static lane slices.
                sig = jax.nn.sigmoid(gates)
                th = jnp.tanh(gates)
                i_g = sig[:, 0 * H:1 * H]                          # PyTorch order
                f_g = sig[:, 1 * H:2 * H]                          # i, f, g, o
                g_g = th[:, 2 * H:3 * H]
                o_g = sig[:, 3 * H:4 * H]
                c = f_g * c + i_g * g_g
                h = o_g * jnp.tanh(c)
                hs.append(h)
            return hs

        hs = None
        layer_in = x_flat
        for l in range(num_layers):
            w_ih_ref, w_hh_ref, b_ref = layer_refs[3 * l:3 * l + 3]
            hs = run_layer(layer_in, w_ih_ref, w_hh_ref, b_ref)
            if l + 1 < num_layers:
                # Time-major flat sequence feeds the next layer's hoisted matmul.
                layer_in = jnp.concatenate(hs, axis=0).astype(bf16)  # [T*B, H]
            # TODO(synk): nn.LSTM inter-layer dropout not modeled (eval / p=0.0).

        # Rearrange the last layer's per-step outputs to batch-major [B*T, H]
        # (row b*T + t) using only 2-D sublane slices + axis-0 concat.
        h_flat = jnp.concatenate(
            [hs[t][b:b + 1, :] for b in range(B) for t in range(T)],
            axis=0).astype(bf16)                                    # [B*T, H]

        # Output projection (single MXU call) + softmax, fused; logits never
        # leave VMEM.
        logits = (jnp.dot(h_flat, w_out_ref[...],
                          preferred_element_type=f32)
                  + b_out_ref[...])                                 # [B*T, V]
        logits = logits.reshape(B, T, V)

        # F.softmax with no dim on a 3-D tensor -> legacy implicit dim=0
        # (softmax over the BATCH axis), reproduced faithfully.
        m = jnp.max(logits, axis=0, keepdims=True)
        e = jnp.exp(logits - m)
        out_ref[...] = e / jnp.sum(e, axis=0, keepdims=True)

    return kernel


def _build_fused_call(B, T, H, V, num_layers):
    kernel = _make_fused_kernel(T, B, H, num_layers)
    n_inputs = 4 + 3 * num_layers + 2
    return pl.pallas_call(
        kernel,
        out_shape=jax.ShapeDtypeStruct((B, T, V), jnp.float32),
        in_specs=[pl.BlockSpec(memory_space=pltpu.MemorySpace.VMEM)
                  for _ in range(n_inputs)],
        out_specs=pl.BlockSpec(memory_space=pltpu.MemorySpace.VMEM),
        compiler_params=pltpu.CompilerParams(
            vmem_limit_bytes=32 * 1024 * 1024),
    )


# ---------------------------------------------------------------------------
# Deterministic parameter init (shapes from VAEDecoder.__init__)
# ---------------------------------------------------------------------------

def init_params(key, opt):
    V, E, L = opt['vocab_size'], opt['emb_dim'], opt['label_dim']
    Bn, C, NL = opt['bottleneck_dim'], opt['num_class'], opt['num_layers']
    ks = iter(jax.random.split(key, 6 + 4 * NL))
    params = {}

    emb = jax.random.uniform(next(ks), (V, E), jnp.float32, -1.0, 1.0)
    params['emb'] = emb.at[0].set(0.0)          # padding_idx = PAD_ID = 0
    params['label_emb'] = jax.random.uniform(next(ks), (C, L), jnp.float32,
                                             -1.0, 1.0)

    s0 = 1.0 / float(Bn) ** 0.5
    params['w0'] = jax.random.uniform(next(ks), (E, Bn), jnp.float32, -s0, s0)
    params['b0'] = jax.random.uniform(next(ks), (E,), jnp.float32, -s0, s0)

    sh = 1.0 / float(E) ** 0.5
    layers = []
    for l in range(NL):
        din = (E + L) if l == 0 else E
        w_ih = jax.random.uniform(next(ks), (4 * E, din), jnp.float32, -sh, sh)
        w_hh = jax.random.uniform(next(ks), (4 * E, E), jnp.float32, -sh, sh)
        b_ih = jax.random.uniform(next(ks), (4 * E,), jnp.float32, -sh, sh)
        b_hh = jax.random.uniform(next(ks), (4 * E,), jnp.float32, -sh, sh)
        layers.append((w_ih, w_hh, b_ih, b_hh))
    params['lstm'] = layers

    params['w_out'] = jax.random.uniform(next(ks), (V, E), jnp.float32, -sh, sh)
    params['b_out'] = jax.random.uniform(next(ks), (V,), jnp.float32, -sh, sh)
    return params


def prepare_params(params):
    """One-time weight prep: transpose, bias-combine, bf16-cast MXU operands."""
    bf16 = jnp.bfloat16
    return {
        'emb': params['emb'],
        'label_emb': params['label_emb'],
        'w0_t': params['w0'].T,                       # [Bn, E] f32
        'b0': params['b0'][None, :],                  # [1, E]  f32
        'lstm': [(w_ih.T.astype(bf16),                # [Din, 4H] bf16
                  w_hh.T.astype(bf16),                # [H,   4H] bf16
                  (b_ih + b_hh)[None, :])             # [1,   4H] f32
                 for (w_ih, w_hh, b_ih, b_hh) in params['lstm']],
        'w_out_t': params['w_out'].T.astype(bf16),    # [H, V] bf16
        'b_out': params['b_out'][None, :],            # [1, V] f32
    }


# ---------------------------------------------------------------------------
# Forward pass (embedding gathers in plain-JAX glue, everything else fused)
# ---------------------------------------------------------------------------

def vae_decoder_forward(prep, z, x_words, x_mask, y, opt):
    B, T = x_mask.shape                               # m, n = x[1].shape
    E, L, V = opt['emb_dim'], opt['label_dim'], opt['vocab_size']
    NL = opt['num_layers']

    # shifted_words = x[0].roll(1, 1); shifted_words[:, 0] = 0 (PAD)
    shifted = jnp.roll(x_words, 1, axis=1).at[:, 0].set(0)

    # Data-dependent embedding gathers stay in plain-JAX glue; the gather is
    # written directly time-major so no activation transpose is materialized.
    input_embs = jnp.take(prep['emb'], shifted.T, axis=0)            # [T, B, E]
    input_labels = jnp.take(prep['label_emb'], y, axis=0)            # [B, L]
    input_labels = jnp.broadcast_to(input_labels[None, :, :], (T, B, L))
    input0 = jnp.concatenate([input_embs, input_labels], axis=2)     # [T,B,E+L]
    input0 = input0.reshape(T * B, E + L)                            # time-major flat

    args = [input0, z, prep['w0_t'], prep['b0']]
    for (w_ih_t, w_hh_t, b) in prep['lstm']:
        args += [w_ih_t, w_hh_t, b]
    args += [prep['w_out_t'], prep['b_out']]

    fused = _build_fused_call(B, T, E, V, NL)
    return fused(*args)                                              # [B, T, V]


# ---------------------------------------------------------------------------

if __name__ == "__main__":
    opt = dict(bottleneck_dim=16, emb_dim=32, label_dim=8, num_layers=2,
               dropout=0.0, vocab_size=32, num_class=3)
    B, T = 2, 8

    key = jax.random.PRNGKey(0)
    k_p, k_z, k_x, k_y = jax.random.split(key, 4)

    params = init_params(k_p, opt)
    prep = prepare_params(params)

    z = jax.random.normal(k_z, (B, opt['bottleneck_dim']), jnp.float32)
    x_words = jax.random.randint(k_x, (B, T), 1, opt['vocab_size'])
    x_mask = jnp.ones((B, T), jnp.float32)   # x[1]: only its shape is used
    y = jax.random.randint(k_y, (B,), 0, opt['num_class'])

    fwd = jax.jit(lambda z_, xw, xm, y_:
                  vae_decoder_forward(prep, z_, xw, xm, y_, opt))
    out = jax.block_until_ready(fwd(z, x_words, x_mask, y))

    assert out.shape == (B, T, opt['vocab_size'])
    assert bool(jnp.all(jnp.isfinite(out)))
    print("KERNEL_OK")
</pallas_src>

<mosaic_0001>
module attributes {stable_mosaic.version = 11 : i64} {
  func.func @kernel(%arg0: memref<16x40xf32, #tpu.memory_space<vmem>>, %arg1: memref<2x16xf32, #tpu.memory_space<vmem>>, %arg2: memref<16x32xf32, #tpu.memory_space<vmem>>, %arg3: memref<1x32xf32, #tpu.memory_space<vmem>>, %arg4: memref<40x128xbf16, #tpu.memory_space<vmem>>, %arg5: memref<32x128xbf16, #tpu.memory_space<vmem>>, %arg6: memref<1x128xf32, #tpu.memory_space<vmem>>, %arg7: memref<32x128xbf16, #tpu.memory_space<vmem>>, %arg8: memref<32x128xbf16, #tpu.memory_space<vmem>>, %arg9: memref<1x128xf32, #tpu.memory_space<vmem>>, %arg10: memref<32x32xbf16, #tpu.memory_space<vmem>>, %arg11: memref<1x32xf32, #tpu.memory_space<vmem>>, %arg12: memref<2x8x32xf32, #tpu.memory_space<vmem>>) attributes {dimension_semantics = [], scalar_prefetch = 0 : i64, scratch_operands = 0 : i64, tpu.core_type = #tpu.core_type<tc>} {
    %c0 = arith.constant 0 : index
    %c0_0 = arith.constant 0 : index
    %0 = vector.load %arg1[%c0, %c0_0] : memref<2x16xf32, #tpu.memory_space<vmem>>, vector<2x16xf32>
    %c0_1 = arith.constant 0 : index
    %c0_2 = arith.constant 0 : index
    %1 = vector.load %arg2[%c0_1, %c0_2] : memref<16x32xf32, #tpu.memory_space<vmem>>, vector<16x32xf32>
    %cst = arith.constant dense<0.000000e+00> : vector<2x32xf32>
    %2 = tpu.matmul %0, %1, %cst {dimension_numbers = #tpu.dot_dimension_numbers<[1], [0], [0], [1], [0, 0, 1, 1], [], []>} : vector<2x16xf32>, vector<16x32xf32>, vector<2x32xf32> -> vector<2x32xf32>
    %c0_3 = arith.constant 0 : index
    %c0_4 = arith.constant 0 : index
    %3 = vector.load %arg3[%c0_3, %c0_4] : memref<1x32xf32, #tpu.memory_space<vmem>>, vector<1x32xf32>
    %4 = vector.broadcast %3 : vector<1x32xf32> to vector<2x32xf32>
    %5 = arith.addf %2, %4 : vector<2x32xf32>
    %cst_5 = arith.constant 0.000000e+00 : f32
    %6 = vector.broadcast %cst_5 : f32 to vector<2x32xf32>
    %7 = arith.maximumf %5, %6 : vector<2x32xf32>
    %cst_6 = arith.constant 0.000000e+00 : f32
    %8 = vector.broadcast %cst_6 : f32 to vector<2x32xf32>
    %c0_7 = arith.constant 0 : index
    %c0_8 = arith.constant 0 : index
    %9 = vector.load %arg0[%c0_7, %c0_8] : memref<16x40xf32, #tpu.memory_space<vmem>>, vector<16x40xf32>
    %10 = arith.truncf %9 : vector<16x40xf32> to vector<16x40xbf16>
    %c0_9 = arith.constant 0 : index
    %c0_10 = arith.constant 0 : index
    %11 = vector.load %arg4[%c0_9, %c0_10] : memref<40x128xbf16, #tpu.memory_space<vmem>>, vector<40x128xbf16>
    %cst_11 = arith.constant dense<0.000000e+00> : vector<16x128xf32>
    %12 = tpu.matmul %10, %11, %cst_11 {dimension_numbers = #tpu.dot_dimension_numbers<[1], [0], [0], [1], [0, 0, 1, 1], [], []>} : vector<16x40xbf16>, vector<40x128xbf16>, vector<16x128xf32> -> vector<16x128xf32>
    %c0_12 = arith.constant 0 : index
    %c0_13 = arith.constant 0 : index
    %13 = vector.load %arg6[%c0_12, %c0_13] : memref<1x128xf32, #tpu.memory_space<vmem>>, vector<1x128xf32>
    %14 = vector.broadcast %13 : vector<1x128xf32> to vector<16x128xf32>
    %15 = arith.addf %12, %14 : vector<16x128xf32>
    %c0_14 = arith.constant 0 : index
    %c0_15 = arith.constant 0 : index
    %16 = vector.load %arg5[%c0_14, %c0_15] : memref<32x128xbf16, #tpu.memory_space<vmem>>, vector<32x128xbf16>
    %17 = vector.extract_strided_slice %15 {offsets = [0, 0], sizes = [2, 128], strides = [1, 1]} : vector<16x128xf32> to vector<2x128xf32>
    %18 = arith.truncf %7 : vector<2x32xf32> to vector<2x32xbf16>
    %cst_16 = arith.constant dense<0.000000e+00> : vector<2x128xf32>
    %19 = tpu.matmul %18, %16, %cst_16 {dimension_numbers = #tpu.dot_dimension_numbers<[1], [0], [0], [1], [0, 0, 1, 1], [], []>} : vector<2x32xbf16>, vector<32x128xbf16>, vector<2x128xf32> -> vector<2x128xf32>
    %20 = arith.addf %17, %19 : vector<2x128xf32>
    %21 = arith.negf %20 : vector<2x128xf32>
    %22 = math.exp %21 : vector<2x128xf32>
    %cst_17 = arith.constant 1.000000e+00 : f32
    %23 = vector.broadcast %cst_17 : f32 to vector<2x128xf32>
    %24 = arith.addf %23, %22 : vector<2x128xf32>
    %25 = arith.divf %23, %24 : vector<2x128xf32>
    %26 = math.tanh %20 : vector<2x128xf32>
    %27 = vector.extract_strided_slice %25 {offsets = [0, 0], sizes = [2, 32], strides = [1, 1]} : vector<2x128xf32> to vector<2x32xf32>
    %28 = vector.extract_strided_slice %25 {offsets = [0, 32], sizes = [2, 32], strides = [1, 1]} : vector<2x128xf32> to vector<2x32xf32>
    %29 = vector.extract_strided_slice %26 {offsets = [0, 64], sizes = [2, 32], strides = [1, 1]} : vector<2x128xf32> to vector<2x32xf32>
    %30 = vector.extract_strided_slice %25 {offsets = [0, 96], sizes = [2, 32], strides = [1, 1]} : vector<2x128xf32> to vector<2x32xf32>
    %31 = arith.mulf %28, %8 : vector<2x32xf32>
    %32 = arith.mulf %27, %29 : vector<2x32xf32>
    %33 = arith.addf %31, %32 : vector<2x32xf32>
    %34 = math.tanh %33 : vector<2x32xf32>
    %35 = arith.mulf %30, %34 : vector<2x32xf32>
    %36 = vector.extract_strided_slice %15 {offsets = [2, 0], sizes = [2, 128], strides = [1, 1]} : vector<16x128xf32> to vector<2x128xf32>
    %37 = arith.truncf %35 : vector<2x32xf32> to vector<2x32xbf16>
    %cst_18 = arith.constant dense<0.000000e+00> : vector<2x128xf32>
    %38 = tpu.matmul %37, %16, %cst_18 {dimension_numbers = #tpu.dot_dimension_numbers<[1], [0], [0], [1], [0, 0, 1, 1], [], []>} : vector<2x32xbf16>, vector<32x128xbf16>, vector<2x128xf32> -> vector<2x128xf32>
    %39 = arith.addf %36, %38 : vector<2x128xf32>
    %40 = arith.negf %39 : vector<2x128xf32>
    %41 = math.exp %40 : vector<2x128xf32>
    %cst_19 = arith.constant 1.000000e+00 : f32
    %42 = vector.broadcast %cst_19 : f32 to vector<2x128xf32>
    %43 = arith.addf %42, %41 : vector<2x128xf32>
    %44 = arith.divf %42, %43 : vector<2x128xf32>
    %45 = math.tanh %39 : vector<2x128xf32>
    %46 = vector.extract_strided_slice %44 {offsets = [0, 0], sizes = [2, 32], strides = [1, 1]} : vector<2x128xf32> to vector<2x32xf32>
    %47 = vector.extract_strided_slice %44 {offsets = [0, 32], sizes = [2, 32], strides = [1, 1]} : vector<2x128xf32> to vector<2x32xf32>
    %48 = vector.extract_strided_slice %45 {offsets = [0, 64], sizes = [2, 32], strides = [1, 1]} : vector<2x128xf32> to vector<2x32xf32>
    %49 = vector.extract_strided_slice %44 {offsets = [0, 96], sizes = [2, 32], strides = [1, 1]} : vector<2x128xf32> to vector<2x32xf32>
    %50 = arith.mulf %47, %33 : vector<2x32xf32>
    %51 = arith.mulf %46, %48 : vector<2x32xf32>
    %52 = arith.addf %50, %51 : vector<2x32xf32>
    %53 = math.tanh %52 : vector<2x32xf32>
    %54 = arith.mulf %49, %53 : vector<2x32xf32>
    %55 = vector.extract_strided_slice %15 {offsets = [4, 0], sizes = [2, 128], strides = [1, 1]} : vector<16x128xf32> to vector<2x128xf32>
    %56 = arith.truncf %54 : vector<2x32xf32> to vector<2x32xbf16>
    %cst_20 = arith.constant dense<0.000000e+00> : vector<2x128xf32>
    %57 = tpu.matmul %56, %16, %cst_20 {dimension_numbers = #tpu.dot_dimension_numbers<[1], [0], [0], [1], [0, 0, 1, 1], [], []>} : vector<2x32xbf16>, vector<32x128xbf16>, vector<2x128xf32> -> vector<2x128xf32>
    %58 = arith.addf %55, %57 : vector<2x128xf32>
    %59 = arith.negf %58 : vector<2x128xf32>
    %60 = math.exp %59 : vector<2x128xf32>
    %cst_21 = arith.constant 1.000000e+00 : f32
    %61 = vector.broadcast %cst_21 : f32 to vector<2x128xf32>
    %62 = arith.addf %61, %60 : vector<2x128xf32>
    %63 = arith.divf %61, %62 : vector<2x128xf32>
    %64 = math.tanh %58 : vector<2x128xf32>
    %65 = vector.extract_strided_slice %63 {offsets = [0, 0], sizes = [2, 32], strides = [1, 1]} : vector<2x128xf32> to vector<2x32xf32>
    %66 = vector.extract_strided_slice %63 {offsets = [0, 32], sizes = [2, 32], strides = [1, 1]} : vector<2x128xf32> to vector<2x32xf32>
    %67 = vector.extract_strided_slice %64 {offsets = [0, 64], sizes = [2, 32], strides = [1, 1]} : vector<2x128xf32> to vector<2x32xf32>
    %68 = vector.extract_strided_slice %63 {offsets = [0, 96], sizes = [2, 32], strides = [1, 1]} : vector<2x128xf32> to vector<2x32xf32>
    %69 = arith.mulf %66, %52 : vector<2x32xf32>
    %70 = arith.mulf %65, %67 : vector<2x32xf32>
    %71 = arith.addf %69, %70 : vector<2x32xf32>
    %72 = math.tanh %71 : vector<2x32xf32>
    %73 = arith.mulf %68, %72 : vector<2x32xf32>
    %74 = vector.extract_strided_slice %15 {offsets = [6, 0], sizes = [2, 128], strides = [1, 1]} : vector<16x128xf32> to vector<2x128xf32>
    %75 = arith.truncf %73 : vector<2x32xf32> to vector<2x32xbf16>
    %cst_22 = arith.constant dense<0.000000e+00> : vector<2x128xf32>
    %76 = tpu.matmul %75, %16, %cst_22 {dimension_numbers = #tpu.dot_dimension_numbers<[1], [0], [0], [1], [0, 0, 1, 1], [], []>} : vector<2x32xbf16>, vector<32x128xbf16>, vector<2x128xf32> -> vector<2x128xf32>
    %77 = arith.addf %74, %76 : vector<2x128xf32>
    %78 = arith.negf %77 : vector<2x128xf32>
    %79 = math.exp %78 : vector<2x128xf32>
    %cst_23 = arith.constant 1.000000e+00 : f32
    %80 = vector.broadcast %cst_23 : f32 to vector<2x128xf32>
    %81 = arith.addf %80, %79 : vector<2x128xf32>
    %82 = arith.divf %80, %81 : vector<2x128xf32>
    %83 = math.tanh %77 : vector<2x128xf32>
    %84 = vector.extract_strided_slice %82 {offsets = [0, 0], sizes = [2, 32], strides = [1, 1]} : vector<2x128xf32> to vector<2x32xf32>
    %85 = vector.extract_strided_slice %82 {offsets = [0, 32], sizes = [2, 32], strides = [1, 1]} : vector<2x128xf32> to vector<2x32xf32>
    %86 = vector.extract_strided_slice %83 {offsets = [0, 64], sizes = [2, 32], strides = [1, 1]} : vector<2x128xf32> to vector<2x32xf32>
    %87 = vector.extract_strided_slice %82 {offsets = [0, 96], sizes = [2, 32], strides = [1, 1]} : vector<2x128xf32> to vector<2x32xf32>
    %88 = arith.mulf %85, %71 : vector<2x32xf32>
    %89 = arith.mulf %84, %86 : vector<2x32xf32>
    %90 = arith.addf %88, %89 : vector<2x32xf32>
    %91 = math.tanh %90 : vector<2x32xf32>
    %92 = arith.mulf %87, %91 : vector<2x32xf32>
    %93 = vector.extract_strided_slice %15 {offsets = [8, 0], sizes = [2, 128], strides = [1, 1]} : vector<16x128xf32> to vector<2x128xf32>
    %94 = arith.truncf %92 : vector<2x32xf32> to vector<2x32xbf16>
    %cst_24 = arith.constant dense<0.000000e+00> : vector<2x128xf32>
    %95 = tpu.matmul %94, %16, %cst_24 {dimension_numbers = #tpu.dot_dimension_numbers<[1], [0], [0], [1], [0, 0, 1, 1], [], []>} : vector<2x32xbf16>, vector<32x128xbf16>, vector<2x128xf32> -> vector<2x128xf32>
    %96 = arith.addf %93, %95 : vector<2x128xf32>
    %97 = arith.negf %96 : vector<2x128xf32>
    %98 = math.exp %97 : vector<2x128xf32>
    %cst_25 = arith.constant 1.000000e+00 : f32
    %99 = vector.broadcast %cst_25 : f32 to vector<2x128xf32>
    %100 = arith.addf %99, %98 : vector<2x128xf32>
    %101 = arith.divf %99, %100 : vector<2x128xf32>
    %102 = math.tanh %96 : vector<2x128xf32>
    %103 = vector.extract_strided_slice %101 {offsets = [0, 0], sizes = [2, 32], strides = [1, 1]} : vector<2x128xf32> to vector<2x32xf32>
    %104 = vector.extract_strided_slice %101 {offsets = [0, 32], sizes = [2, 32], strides = [1, 1]} : vector<2x128xf32> to vector<2x32xf32>
    %105 = vector.extract_strided_slice %102 {offsets = [0, 64], sizes = [2, 32], strides = [1, 1]} : vector<2x128xf32> to vector<2x32xf32>
    %106 = vector.extract_strided_slice %101 {offsets = [0, 96], sizes = [2, 32], strides = [1, 1]} : vector<2x128xf32> to vector<2x32xf32>
    %107 = arith.mulf %104, %90 : vector<2x32xf32>
    %108 = arith.mulf %103, %105 : vector<2x32xf32>
    %109 = arith.addf %107, %108 : vector<2x32xf32>
    %110 = math.tanh %109 : vector<2x32xf32>
    %111 = arith.mulf %106, %110 : vector<2x32xf32>
    %112 = vector.extract_strided_slice %15 {offsets = [10, 0], sizes = [2, 128], strides = [1, 1]} : vector<16x128xf32> to vector<2x128xf32>
    %113 = arith.truncf %111 : vector<2x32xf32> to vector<2x32xbf16>
    %cst_26 = arith.constant dense<0.000000e+00> : vector<2x128xf32>
    %114 = tpu.matmul %113, %16, %cst_26 {dimension_numbers = #tpu.dot_dimension_numbers<[1], [0], [0], [1], [0, 0, 1, 1], [], []>} : vector<2x32xbf16>, vector<32x128xbf16>, vector<2x128xf32> -> vector<2x128xf32>
    %115 = arith.addf %112, %114 : vector<2x128xf32>
    %116 = arith.negf %115 : vector<2x128xf32>
    %117 = math.exp %116 : vector<2x128xf32>
    %cst_27 = arith.constant 1.000000e+00 : f32
    %118 = vector.broadcast %cst_27 : f32 to vector<2x128xf32>
    %119 = arith.addf %118, %117 : vector<2x128xf32>
    %120 = arith.divf %118, %119 : vector<2x128xf32>
    %121 = math.tanh %115 : vector<2x128xf32>
    %122 = vector.extract_strided_slice %120 {offsets = [0, 0], sizes = [2, 32], strides = [1, 1]} : vector<2x128xf32> to vector<2x32xf32>
    %123 = vector.extract_strided_slice %120 {offsets = [0, 32], sizes = [2, 32], strides = [1, 1]} : vector<2x128xf32> to vector<2x32xf32>
    %124 = vector.extract_strided_slice %121 {offsets = [0, 64], sizes = [2, 32], strides = [1, 1]} : vector<2x128xf32> to vector<2x32xf32>
    %125 = vector.extract_strided_slice %120 {offsets = [0, 96], sizes = [2, 32], strides = [1, 1]} : vector<2x128xf32> to vector<2x32xf32>
    %126 = arith.mulf %123, %109 : vector<2x32xf32>
    %127 = arith.mulf %122, %124 : vector<2x32xf32>
    %128 = arith.addf %126, %127 : vector<2x32xf32>
    %129 = math.tanh %128 : vector<2x32xf32>
    %130 = arith.mulf %125, %129 : vector<2x32xf32>
    %131 = vector.extract_strided_slice %15 {offsets = [12, 0], sizes = [2, 128], strides = [1, 1]} : vector<16x128xf32> to vector<2x128xf32>
    %132 = arith.truncf %130 : vector<2x32xf32> to vector<2x32xbf16>
    %cst_28 = arith.constant dense<0.000000e+00> : vector<2x128xf32>
    %133 = tpu.matmul %132, %16, %cst_28 {dimension_numbers = #tpu.dot_dimension_numbers<[1], [0], [0], [1], [0, 0, 1, 1], [], []>} : vector<2x32xbf16>, vector<32x128xbf16>, vector<2x128xf32> -> vector<2x128xf32>
    %134 = arith.addf %131, %133 : vector<2x128xf32>
    %135 = arith.negf %134 : vector<2x128xf32>
    %136 = math.exp %135 : vector<2x128xf32>
    %cst_29 = arith.constant 1.000000e+00 : f32
    %137 = vector.broadcast %cst_29 : f32 to vector<2x128xf32>
    %138 = arith.addf %137, %136 : vector<2x128xf32>
    %139 = arith.divf %137, %138 : vector<2x128xf32>
    %140 = math.tanh %134 : vector<2x128xf32>
    %141 = vector.extract_strided_slice %139 {offsets = [0, 0], sizes = [2, 32], strides = [1, 1]} : vector<2x128xf32> to vector<2x32xf32>
    %142 = vector.extract_strided_slice %139 {offsets = [0, 32], sizes = [2, 32], strides = [1, 1]} : vector<2x128xf32> to vector<2x32xf32>
    %143 = vector.extract_strided_slice %140 {offsets = [0, 64], sizes = [2, 32], strides = [1, 1]} : vector<2x128xf32> to vector<2x32xf32>
    %144 = vector.extract_strided_slice %139 {offsets = [0, 96], sizes = [2, 32], strides = [1, 1]} : vector<2x128xf32> to vector<2x32xf32>
    %145 = arith.mulf %142, %128 : vector<2x32xf32>
    %146 = arith.mulf %141, %143 : vector<2x32xf32>
    %147 = arith.addf %145, %146 : vector<2x32xf32>
    %148 = math.tanh %147 : vector<2x32xf32>
    %149 = arith.mulf %144, %148 : vector<2x32xf32>
    %150 = vector.extract_strided_slice %15 {offsets = [14, 0], sizes = [2, 128], strides = [1, 1]} : vector<16x128xf32> to vector<2x128xf32>
    %151 = arith.truncf %149 : vector<2x32xf32> to vector<2x32xbf16>
    %cst_30 = arith.constant dense<0.000000e+00> : vector<2x128xf32>
    %152 = tpu.matmul %151, %16, %cst_30 {dimension_numbers = #tpu.dot_dimension_numbers<[1], [0], [0], [1], [0, 0, 1, 1], [], []>} : vector<2x32xbf16>, vector<32x128xbf16>, vector<2x128xf32> -> vector<2x128xf32>
    %153 = arith.addf %150, %152 : vector<2x128xf32>
    %154 = arith.negf %153 : vector<2x128xf32>
    %155 = math.exp %154 : vector<2x128xf32>
    %cst_31 = arith.constant 1.000000e+00 : f32
    %156 = vector.broadcast %cst_31 : f32 to vector<2x128xf32>
    %157 = arith.addf %156, %155 : vector<2x128xf32>
    %158 = arith.divf %156, %157 : vector<2x128xf32>
    %159 = math.tanh %153 : vector<2x128xf32>
    %160 = vector.extract_strided_slice %158 {offsets = [0, 0], sizes = [2, 32], strides = [1, 1]} : vector<2x128xf32> to vector<2x32xf32>
    %161 = vector.extract_strided_slice %158 {offsets = [0, 32], sizes = [2, 32], strides = [1, 1]} : vector<2x128xf32> to vector<2x32xf32>
    %162 = vector.extract_strided_slice %159 {offsets = [0, 64], sizes = [2, 32], strides = [1, 1]} : vector<2x128xf32> to vector<2x32xf32>
    %163 = vector.extract_strided_slice %158 {offsets = [0, 96], sizes = [2, 32], strides = [1, 1]} : vector<2x128xf32> to vector<2x32xf32>
    %164 = arith.mulf %161, %147 : vector<2x32xf32>
    %165 = arith.mulf %160, %162 : vector<2x32xf32>
    %166 = arith.addf %164, %165 : vector<2x32xf32>
    %167 = math.tanh %166 : vector<2x32xf32>
    %168 = arith.mulf %163, %167 : vector<2x32xf32>
    %169 = tpu.concatenate %35, %54, %73, %92, %111, %130, %149, %168 in 0 : vector<2x32xf32>, vector<2x32xf32>, vector<2x32xf32>, vector<2x32xf32>, vector<2x32xf32>, vector<2x32xf32>, vector<2x32xf32>, vector<2x32xf32> -> vector<16x32xf32>
    %170 = arith.truncf %169 : vector<16x32xf32> to vector<16x32xbf16>
    %c0_32 = arith.constant 0 : index
    %c0_33 = arith.constant 0 : index
    %171 = vector.load %arg7[%c0_32, %c0_33] : memref<32x128xbf16, #tpu.memory_space<vmem>>, vector<32x128xbf16>
    %cst_34 = arith.constant dense<0.000000e+00> : vector<16x128xf32>
    %172 = tpu.matmul %170, %171, %cst_34 {dimension_numbers = #tpu.dot_dimension_numbers<[1], [0], [0], [1], [0, 0, 1, 1], [], []>} : vector<16x32xbf16>, vector<32x128xbf16>, vector<16x128xf32> -> vector<16x128xf32>
    %c0_35 = arith.constant 0 : index
    %c0_36 = arith.constant 0 : index
    %173 = vector.load %arg9[%c0_35, %c0_36] : memref<1x128xf32, #tpu.memory_space<vmem>>, vector<1x128xf32>
    %174 = vector.broadcast %173 : vector<1x128xf32> to vector<16x128xf32>
    %175 = arith.addf %172, %174 : vector<16x128xf32>
    %c0_37 = arith.constant 0 : index
    %c0_38 = arith.constant 0 : index
    %176 = vector.load %arg8[%c0_37, %c0_38] : memref<32x128xbf16, #tpu.memory_space<vmem>>, vector<32x128xbf16>
    %177 = vector.extract_strided_slice %175 {offsets = [0, 0], sizes = [2, 128], strides = [1, 1]} : vector<16x128xf32> to vector<2x128xf32>
    %178 = arith.truncf %7 : vector<2x32xf32> to vector<2x32xbf16>
    %cst_39 = arith.constant dense<0.000000e+00> : vector<2x128xf32>
    %179 = tpu.matmul %178, %176, %cst_39 {dimension_numbers = #tpu.dot_dimension_numbers<[1], [0], [0], [1], [0, 0, 1, 1], [], []>} : vector<2x32xbf16>, vector<32x128xbf16>, vector<2x128xf32> -> vector<2x128xf32>
    %180 = arith.addf %177, %179 : vector<2x128xf32>
    %181 = arith.negf %180 : vector<2x128xf32>
    %182 = math.exp %181 : vector<2x128xf32>
    %cst_40 = arith.constant 1.000000e+00 : f32
    %183 = vector.broadcast %cst_40 : f32 to vector<2x128xf32>
    %184 = arith.addf %183, %182 : vector<2x128xf32>
    %185 = arith.divf %183, %184 : vector<2x128xf32>
    %186 = math.tanh %180 : vector<2x128xf32>
    %187 = vector.extract_strided_slice %185 {offsets = [0, 0], sizes = [2, 32], strides = [1, 1]} : vector<2x128xf32> to vector<2x32xf32>
    %188 = vector.extract_strided_slice %185 {offsets = [0, 32], sizes = [2, 32], strides = [1, 1]} : vector<2x128xf32> to vector<2x32xf32>
    %189 = vector.extract_strided_slice %186 {offsets = [0, 64], sizes = [2, 32], strides = [1, 1]} : vector<2x128xf32> to vector<2x32xf32>
    %190 = vector.extract_strided_slice %185 {offsets = [0, 96], sizes = [2, 32], strides = [1, 1]} : vector<2x128xf32> to vector<2x32xf32>
    %191 = arith.mulf %188, %8 : vector<2x32xf32>
    %192 = arith.mulf %187, %189 : vector<2x32xf32>
    %193 = arith.addf %191, %192 : vector<2x32xf32>
    %194 = math.tanh %193 : vector<2x32xf32>
    %195 = arith.mulf %190, %194 : vector<2x32xf32>
    %196 = vector.extract_strided_slice %175 {offsets = [2, 0], sizes = [2, 128], strides = [1, 1]} : vector<16x128xf32> to vector<2x128xf32>
    %197 = arith.truncf %195 : vector<2x32xf32> to vector<2x32xbf16>
    %cst_41 = arith.constant dense<0.000000e+00> : vector<2x128xf32>
    %198 = tpu.matmul %197, %176, %cst_41 {dimension_numbers = #tpu.dot_dimension_numbers<[1], [0], [0], [1], [0, 0, 1, 1], [], []>} : vector<2x32xbf16>, vector<32x128xbf16>, vector<2x128xf32> -> vector<2x128xf32>
    %199 = arith.addf %196, %198 : vector<2x128xf32>
    %200 = arith.negf %199 : vector<2x128xf32>
    %201 = math.exp %200 : vector<2x128xf32>
    %cst_42 = arith.constant 1.000000e+00 : f32
    %202 = vector.broadcast %cst_42 : f32 to vector<2x128xf32>
    %203 = arith.addf %202, %201 : vector<2x128xf32>
    %204 = arith.divf %202, %203 : vector<2x128xf32>
    %205 = math.tanh %199 : vector<2x128xf32>
    %206 = vector.extract_strided_slice %204 {offsets = [0, 0], sizes = [2, 32], strides = [1, 1]} : vector<2x128xf32> to vector<2x32xf32>
    %207 = vector.extract_strided_slice %204 {offsets = [0, 32], sizes = [2, 32], strides = [1, 1]} : vector<2x128xf32> to vector<2x32xf32>
    %208 = vector.extract_strided_slice %205 {offsets = [0, 64], sizes = [2, 32], strides = [1, 1]} : vector<2x128xf32> to vector<2x32xf32>
    %209 = vector.extract_strided_slice %204 {offsets = [0, 96], sizes = [2, 32], strides = [1, 1]} : vector<2x128xf32> to vector<2x32xf32>
    %210 = arith.mulf %207, %193 : vector<2x32xf32>
    %211 = arith.mulf %206, %208 : vector<2x32xf32>
    %212 = arith.addf %210, %211 : vector<2x32xf32>
    %213 = math.tanh %212 : vector<2x32xf32>
    %214 = arith.mulf %209, %213 : vector<2x32xf32>
    %215 = vector.extract_strided_slice %175 {offsets = [4, 0], sizes = [2, 128], strides = [1, 1]} : vector<16x128xf32> to vector<2x128xf32>
    %216 = arith.truncf %214 : vector<2x32xf32> to vector<2x32xbf16>
    %cst_43 = arith.constant dense<0.000000e+00> : vector<2x128xf32>
    %217 = tpu.matmul %216, %176, %cst_43 {dimension_numbers = #tpu.dot_dimension_numbers<[1], [0], [0], [1], [0, 0, 1, 1], [], []>} : vector<2x32xbf16>, vector<32x128xbf16>, vector<2x128xf32> -> vector<2x128xf32>
    %218 = arith.addf %215, %217 : vector<2x128xf32>
    %219 = arith.negf %218 : vector<2x128xf32>
    %220 = math.exp %219 : vector<2x128xf32>
    %cst_44 = arith.constant 1.000000e+00 : f32
    %221 = vector.broadcast %cst_44 : f32 to vector<2x128xf32>
    %222 = arith.addf %221, %220 : vector<2x128xf32>
    %223 = arith.divf %221, %222 : vector<2x128xf32>
    %224 = math.tanh %218 : vector<2x128xf32>
    %225 = vector.extract_strided_slice %223 {offsets = [0, 0], sizes = [2, 32], strides = [1, 1]} : vector<2x128xf32> to vector<2x32xf32>
    %226 = vector.extract_strided_slice %223 {offsets = [0, 32], sizes = [2, 32], strides = [1, 1]} : vector<2x128xf32> to vector<2x32xf32>
    %227 = vector.extract_strided_slice %224 {offsets = [0, 64], sizes = [2, 32], strides = [1, 1]} : vector<2x128xf32> to vector<2x32xf32>
    %228 = vector.extract_strided_slice %223 {offsets = [0, 96], sizes = [2, 32], strides = [1, 1]} : vector<2x128xf32> to vector<2x32xf32>
    %229 = arith.mulf %226, %212 : vector<2x32xf32>
    %230 = arith.mulf %225, %227 : vector<2x32xf32>
    %231 = arith.addf %229, %230 : vector<2x32xf32>
    %232 = math.tanh %231 : vector<2x32xf32>
    %233 = arith.mulf %228, %232 : vector<2x32xf32>
    %234 = vector.extract_strided_slice %175 {offsets = [6, 0], sizes = [2, 128], strides = [1, 1]} : vector<16x128xf32> to vector<2x128xf32>
    %235 = arith.truncf %233 : vector<2x32xf32> to vector<2x32xbf16>
    %cst_45 = arith.constant dense<0.000000e+00> : vector<2x128xf32>
    %236 = tpu.matmul %235, %176, %cst_45 {dimension_numbers = #tpu.dot_dimension_numbers<[1], [0], [0], [1], [0, 0, 1, 1], [], []>} : vector<2x32xbf16>, vector<32x128xbf16>, vector<2x128xf32> -> vector<2x128xf32>
    %237 = arith.addf %234, %236 : vector<2x128xf32>
    %238 = arith.negf %237 : vector<2x128xf32>
    %239 = math.exp %238 : vector<2x128xf32>
    %cst_46 = arith.constant 1.000000e+00 : f32
    %240 = vector.broadcast %cst_46 : f32 to vector<2x128xf32>
    %241 = arith.addf %240, %239 : vector<2x128xf32>
    %242 = arith.divf %240, %241 : vector<2x128xf32>
    %243 = math.tanh %237 : vector<2x128xf32>
    %244 = vector.extract_strided_slice %242 {offsets = [0, 0], sizes = [2, 32], strides = [1, 1]} : vector<2x128xf32> to vector<2x32xf32>
    %245 = vector.extract_strided_slice %242 {offsets = [0, 32], sizes = [2, 32], strides = [1, 1]} : vector<2x128xf32> to vector<2x32xf32>
    %246 = vector.extract_strided_slice %243 {offsets = [0, 64], sizes = [2, 32], strides = [1, 1]} : vector<2x128xf32> to vector<2x32xf32>
    %247 = vector.extract_strided_slice %242 {offsets = [0, 96], sizes = [2, 32], strides = [1, 1]} : vector<2x128xf32> to vector<2x32xf32>
    %248 = arith.mulf %245, %231 : vector<2x32xf32>
    %249 = arith.mulf %244, %246 : vector<2x32xf32>
    %250 = arith.addf %248, %249 : vector<2x32xf32>
    %251 = math.tanh %250 : vector<2x32xf32>
    %252 = arith.mulf %247, %251 : vector<2x32xf32>
    %253 = vector.extract_strided_slice %175 {offsets = [8, 0], sizes = [2, 128], strides = [1, 1]} : vector<16x128xf32> to vector<2x128xf32>
    %254 = arith.truncf %252 : vector<2x32xf32> to vector<2x32xbf16>
    %cst_47 = arith.constant dense<0.000000e+00> : vector<2x128xf32>
    %255 = tpu.matmul %254, %176, %cst_47 {dimension_numbers = #tpu.dot_dimension_numbers<[1], [0], [0], [1], [0, 0, 1, 1], [], []>} : vector<2x32xbf16>, vector<32x128xbf16>, vector<2x128xf32> -> vector<2x128xf32>
    %256 = arith.addf %253, %255 : vector<2x128xf32>
    %257 = arith.negf %256 : vector<2x128xf32>
    %258 = math.exp %257 : vector<2x128xf32>
    %cst_48 = arith.constant 1.000000e+00 : f32
    %259 = vector.broadcast %cst_48 : f32 to vector<2x128xf32>
    %260 = arith.addf %259, %258 : vector<2x128xf32>
    %261 = arith.divf %259, %260 : vector<2x128xf32>
    %262 = math.tanh %256 : vector<2x128xf32>
    %263 = vector.extract_strided_slice %261 {offsets = [0, 0], sizes = [2, 32], strides = [1, 1]} : vector<2x128xf32> to vector<2x32xf32>
    %264 = vector.extract_strided_slice %261 {offsets = [0, 32], sizes = [2, 32], strides = [1, 1]} : vector<2x128xf32> to vector<2x32xf32>
    %265 = vector.extract_strided_slice %262 {offsets = [0, 64], sizes = [2, 32], strides = [1, 1]} : vector<2x128xf32> to vector<2x32xf32>
    %266 = vector.extract_strided_slice %261 {offsets = [0, 96], sizes = [2, 32], strides = [1, 1]} : vector<2x128xf32> to vector<2x32xf32>
    %267 = arith.mulf %264, %250 : vector<2x32xf32>
    %268 = arith.mulf %263, %265 : vector<2x32xf32>
    %269 = arith.addf %267, %268 : vector<2x32xf32>
    %270 = math.tanh %269 : vector<2x32xf32>
    %271 = arith.mulf %266, %270 : vector<2x32xf32>
    %272 = vector.extract_strided_slice %175 {offsets = [10, 0], sizes = [2, 128], strides = [1, 1]} : vector<16x128xf32> to vector<2x128xf32>
    %273 = arith.truncf %271 : vector<2x32xf32> to vector<2x32xbf16>
    %cst_49 = arith.constant dense<0.000000e+00> : vector<2x128xf32>
    %274 = tpu.matmul %273, %176, %cst_49 {dimension_numbers = #tpu.dot_dimension_numbers<[1], [0], [0], [1], [0, 0, 1, 1], [], []>} : vector<2x32xbf16>, vector<32x128xbf16>, vector<2x128xf32> -> vector<2x128xf32>
    %275 = arith.addf %272, %274 : vector<2x128xf32>
    %276 = arith.negf %275 : vector<2x128xf32>
    %277 = math.exp %276 : vector<2x128xf32>
    %cst_50 = arith.constant 1.000000e+00 : f32
    %278 = vector.broadcast %cst_50 : f32 to vector<2x128xf32>
    %279 = arith.addf %278, %277 : vector<2x128xf32>
    %280 = arith.divf %278, %279 : vector<2x128xf32>
    %281 = math.tanh %275 : vector<2x128xf32>
    %282 = vector.extract_strided_slice %280 {offsets = [0, 0], sizes = [2, 32], strides = [1, 1]} : vector<2x128xf32> to vector<2x32xf32>
    %283 = vector.extract_strided_slice %280 {offsets = [0, 32], sizes = [2, 32], strides = [1, 1]} : vector<2x128xf32> to vector<2x32xf32>
    %284 = vector.extract_strided_slice %281 {offsets = [0, 64], sizes = [2, 32], strides = [1, 1]} : vector<2x128xf32> to vector<2x32xf32>
    %285 = vector.extract_strided_slice %280 {offsets = [0, 96], sizes = [2, 32], strides = [1, 1]} : vector<2x128xf32> to vector<2x32xf32>
    %286 = arith.mulf %283, %269 : vector<2x32xf32>
    %287 = arith.mulf %282, %284 : vector<2x32xf32>
    %288 = arith.addf %286, %287 : vector<2x32xf32>
    %289 = math.tanh %288 : vector<2x32xf32>
    %290 = arith.mulf %285, %289 : vector<2x32xf32>
    %291 = vector.extract_strided_slice %175 {offsets = [12, 0], sizes = [2, 128], strides = [1, 1]} : vector<16x128xf32> to vector<2x128xf32>
    %292 = arith.truncf %290 : vector<2x32xf32> to vector<2x32xbf16>
    %cst_51 = arith.constant dense<0.000000e+00> : vector<2x128xf32>
    %293 = tpu.matmul %292, %176, %cst_51 {dimension_numbers = #tpu.dot_dimension_numbers<[1], [0], [0], [1], [0, 0, 1, 1], [], []>} : vector<2x32xbf16>, vector<32x128xbf16>, vector<2x128xf32> -> vector<2x128xf32>
    %294 = arith.addf %291, %293 : vector<2x128xf32>
    %295 = arith.negf %294 : vector<2x128xf32>
    %296 = math.exp %295 : vector<2x128xf32>
    %cst_52 = arith.constant 1.000000e+00 : f32
    %297 = vector.broadcast %cst_52 : f32 to vector<2x128xf32>
    %298 = arith.addf %297, %296 : vector<2x128xf32>
    %299 = arith.divf %297, %298 : vector<2x128xf32>
    %300 = math.tanh %294 : vector<2x128xf32>
    %301 = vector.extract_strided_slice %299 {offsets = [0, 0], sizes = [2, 32], strides = [1, 1]} : vector<2x128xf32> to vector<2x32xf32>
    %302 = vector.extract_strided_slice %299 {offsets = [0, 32], sizes = [2, 32], strides = [1, 1]} : vector<2x128xf32> to vector<2x32xf32>
    %303 = vector.extract_strided_slice %300 {offsets = [0, 64], sizes = [2, 32], strides = [1, 1]} : vector<2x128xf32> to vector<2x32xf32>
    %304 = vector.extract_strided_slice %299 {offsets = [0, 96], sizes = [2, 32], strides = [1, 1]} : vector<2x128xf32> to vector<2x32xf32>
    %305 = arith.mulf %302, %288 : vector<2x32xf32>
    %306 = arith.mulf %301, %303 : vector<2x32xf32>
    %307 = arith.addf %305, %306 : vector<2x32xf32>
    %308 = math.tanh %307 : vector<2x32xf32>
    %309 = arith.mulf %304, %308 : vector<2x32xf32>
    %310 = vector.extract_strided_slice %175 {offsets = [14, 0], sizes = [2, 128], strides = [1, 1]} : vector<16x128xf32> to vector<2x128xf32>
    %311 = arith.truncf %309 : vector<2x32xf32> to vector<2x32xbf16>
    %cst_53 = arith.constant dense<0.000000e+00> : vector<2x128xf32>
    %312 = tpu.matmul %311, %176, %cst_53 {dimension_numbers = #tpu.dot_dimension_numbers<[1], [0], [0], [1], [0, 0, 1, 1], [], []>} : vector<2x32xbf16>, vector<32x128xbf16>, vector<2x128xf32> -> vector<2x128xf32>
    %313 = arith.addf %310, %312 : vector<2x128xf32>
    %314 = arith.negf %313 : vector<2x128xf32>
    %315 = math.exp %314 : vector<2x128xf32>
    %cst_54 = arith.constant 1.000000e+00 : f32
    %316 = vector.broadcast %cst_54 : f32 to vector<2x128xf32>
    %317 = arith.addf %316, %315 : vector<2x128xf32>
    %318 = arith.divf %316, %317 : vector<2x128xf32>
    %319 = math.tanh %313 : vector<2x128xf32>
    %320 = vector.extract_strided_slice %318 {offsets = [0, 0], sizes = [2, 32], strides = [1, 1]} : vector<2x128xf32> to vector<2x32xf32>
    %321 = vector.extract_strided_slice %318 {offsets = [0, 32], sizes = [2, 32], strides = [1, 1]} : vector<2x128xf32> to vector<2x32xf32>
    %322 = vector.extract_strided_slice %319 {offsets = [0, 64], sizes = [2, 32], strides = [1, 1]} : vector<2x128xf32> to vector<2x32xf32>
    %323 = vector.extract_strided_slice %318 {offsets = [0, 96], sizes = [2, 32], strides = [1, 1]} : vector<2x128xf32> to vector<2x32xf32>
    %324 = arith.mulf %321, %307 : vector<2x32xf32>
    %325 = arith.mulf %320, %322 : vector<2x32xf32>
    %326 = arith.addf %324, %325 : vector<2x32xf32>
    %327 = math.tanh %326 : vector<2x32xf32>
    %328 = arith.mulf %323, %327 : vector<2x32xf32>
    %329 = vector.extract_strided_slice %195 {offsets = [0, 0], sizes = [1, 32], strides = [1, 1]} : vector<2x32xf32> to vector<1x32xf32>
    %330 = vector.extract_strided_slice %214 {offsets = [0, 0], sizes = [1, 32], strides = [1, 1]} : vector<2x32xf32> to vector<1x32xf32>
    %331 = vector.extract_strided_slice %233 {offsets = [0, 0], sizes = [1, 32], strides = [1, 1]} : vector<2x32xf32> to vector<1x32xf32>
    %332 = vector.extract_strided_slice %252 {offsets = [0, 0], sizes = [1, 32], strides = [1, 1]} : vector<2x32xf32> to vector<1x32xf32>
    %333 = vector.extract_strided_slice %271 {offsets = [0, 0], sizes = [1, 32], strides = [1, 1]} : vector<2x32xf32> to vector<1x32xf32>
    %334 = vector.extract_strided_slice %290 {offsets = [0, 0], sizes = [1, 32], strides = [1, 1]} : vector<2x32xf32> to vector<1x32xf32>
    %335 = vector.extract_strided_slice %309 {offsets = [0, 0], sizes = [1, 32], strides = [1, 1]} : vector<2x32xf32> to vector<1x32xf32>
    %336 = vector.extract_strided_slice %328 {offsets = [0, 0], sizes = [1, 32], strides = [1, 1]} : vector<2x32xf32> to vector<1x32xf32>
    %337 = vector.extract_strided_slice %195 {offsets = [1, 0], sizes = [1, 32], strides = [1, 1]} : vector<2x32xf32> to vector<1x32xf32>
    %338 = vector.extract_strided_slice %214 {offsets = [1, 0], sizes = [1, 32], strides = [1, 1]} : vector<2x32xf32> to vector<1x32xf32>
    %339 = vector.extract_strided_slice %233 {offsets = [1, 0], sizes = [1, 32], strides = [1, 1]} : vector<2x32xf32> to vector<1x32xf32>
    %340 = vector.extract_strided_slice %252 {offsets = [1, 0], sizes = [1, 32], strides = [1, 1]} : vector<2x32xf32> to vector<1x32xf32>
    %341 = vector.extract_strided_slice %271 {offsets = [1, 0], sizes = [1, 32], strides = [1, 1]} : vector<2x32xf32> to vector<1x32xf32>
    %342 = vector.extract_strided_slice %290 {offsets = [1, 0], sizes = [1, 32], strides = [1, 1]} : vector<2x32xf32> to vector<1x32xf32>
    %343 = vector.extract_strided_slice %309 {offsets = [1, 0], sizes = [1, 32], strides = [1, 1]} : vector<2x32xf32> to vector<1x32xf32>
    %344 = vector.extract_strided_slice %328 {offsets = [1, 0], sizes = [1, 32], strides = [1, 1]} : vector<2x32xf32> to vector<1x32xf32>
    %345 = tpu.concatenate %329, %330, %331, %332, %333, %334, %335, %336, %337, %338, %339, %340, %341, %342, %343, %344 in 0 : vector<1x32xf32>, vector<1x32xf32>, vector<1x32xf32>, vector<1x32xf32>, vector<1x32xf32>, vector<1x32xf32>, vector<1x32xf32>, vector<1x32xf32>, vector<1x32xf32>, vector<1x32xf32>, vector<1x32xf32>, vector<1x32xf32>, vector<1x32xf32>, vector<1x32xf32>, vector<1x32xf32>, vector<1x32xf32> -> vector<16x32xf32>
    %346 = arith.truncf %345 : vector<16x32xf32> to vector<16x32xbf16>
    %c0_55 = arith.constant 0 : index
    %c0_56 = arith.constant 0 : index
    %347 = vector.load %arg10[%c0_55, %c0_56] : memref<32x32xbf16, #tpu.memory_space<vmem>>, vector<32x32xbf16>
    %cst_57 = arith.constant dense<0.000000e+00> : vector<16x32xf32>
    %348 = tpu.matmul %346, %347, %cst_57 {dimension_numbers = #tpu.dot_dimension_numbers<[1], [0], [0], [1], [0, 0, 1, 1], [], []>} : vector<16x32xbf16>, vector<32x32xbf16>, vector<16x32xf32> -> vector<16x32xf32>
    %c0_58 = arith.constant 0 : index
    %c0_59 = arith.constant 0 : index
    %349 = vector.load %arg11[%c0_58, %c0_59] : memref<1x32xf32, #tpu.memory_space<vmem>>, vector<1x32xf32>
    %350 = vector.broadcast %349 : vector<1x32xf32> to vector<16x32xf32>
    %351 = arith.addf %348, %350 : vector<16x32xf32>
    %352 = vector.shape_cast %351 : vector<16x32xf32> to vector<2x8x32xf32>
    %cst_60 = arith.constant dense<0xFF800000> : vector<8x32xf32>
    %353 = vector.multi_reduction <maximumf>, %352, %cst_60 [0] : vector<2x8x32xf32> to vector<8x32xf32>
    %354 = vector.shape_cast %353 : vector<8x32xf32> to vector<1x8x32xf32>
    %355 = vector.broadcast %354 : vector<1x8x32xf32> to vector<2x8x32xf32>
    %356 = arith.subf %352, %355 : vector<2x8x32xf32>
    %357 = math.exp %356 : vector<2x8x32xf32>
    %cst_61 = arith.constant dense<0.000000e+00> : vector<8x32xf32>
    %358 = vector.multi_reduction <add>, %357, %cst_61 [0] : vector<2x8x32xf32> to vector<8x32xf32>
    %359 = vector.shape_cast %358 : vector<8x32xf32> to vector<1x8x32xf32>
    %360 = vector.broadcast %359 : vector<1x8x32xf32> to vector<2x8x32xf32>
    %361 = arith.divf %357, %360 : vector<2x8x32xf32>
    %c0_62 = arith.constant 0 : index
    %c0_63 = arith.constant 0 : index
    %c0_64 = arith.constant 0 : index
    %362 = vector.load %arg12[%c0_62, %c0_63, %c0_64] : memref<2x8x32xf32, #tpu.memory_space<vmem>>, vector<2x8x32xf32>
    tpu.vector_store %arg12[%c0_62, %c0_63, %c0_64], %361 {strides = array<i32>} : memref<2x8x32xf32, #tpu.memory_space<vmem>>, vector<2x8x32xf32>,
    return
  }
}

</mosaic_0001>

<bundles_post_ra>
// kernel: _lambda_.1
= control target key start
LH: loop header
LB: loop body
LE: loop exit
PB: predicated region body
PF: predicated region fallthrough
CT: control target
= control target key end

     0   :  { %vm50_vm0 = vcmask 130048   ;;  %vm106_vm1 = vcmask 1043456   ;;  %s1922_s0 = inlined_call_operand.vmem [shape: f32[16,40], index: 0, kind: input, shape index: {}]   ;;  %s1923_s1 = inlined_call_operand.vmem [shape: f32[2,16], index: 1, kind: input, shape index: {}]   ;;  %s1924_s2 = inlined_call_operand.vmem [shape: f32[16,32], index: 2, kind: input, shape index: {}]   ;;  %s1925_s3 = inlined_call_operand.vmem [shape: f32[1,32], index: 3, kind: input, shape index: {}]   ;;  %s1926_s4 = inlined_call_operand.vmem [shape: bf16[40,128], index: 4, kind: input, shape index: {}]   ;;  %s1927_s5 = inlined_call_operand.vmem [shape: bf16[32,128], index: 5, kind: input, shape index: {}]   ;;  %s1928_s6 = inlined_call_operand.vmem [shape: f32[1,128], index: 6, kind: input, shape index: {}]   ;;  %s1929_s7 = inlined_call_operand.vmem [shape: bf16[32,128], index: 7, kind: input, shape index: {}]   ;;  %s1930_s8 = inlined_call_operand.vmem [shape: bf16[32,128], index: 8, kind: input, shape index: {}]   ;;  %s1931_s9 = inlined_call_operand.vmem [shape: f32[1,128], index: 9, kind: input, shape index: {}]   ;;  %s1932_s10 = inlined_call_operand.vmem [shape: bf16[32,32], index: 10, kind: input, shape index: {}]   ;;  %s1933_s11 = inlined_call_operand.vmem [shape: f32[1,32], index: 11, kind: input, shape index: {}]   ;;  %s1934_s12 = inlined_call_operand.hbm [shape: f32[2,8,32], index: 12, kind: output, shape index: {}]  }
   0x1   :  { %v45_v0 = vld [vmem:[%s1924_s2 + $0x8] sm:$0xff]  ;;  %v44_v1 = vld [vmem:[%s1924_s2] sm:$0xff]  ;;  %v82_v3 = vld [vmem:[%s1926_s4 + $0x10] sm:$0xf] }
   0x2   :  { %v43_v2 = vld [vmem:[%s1923_s1] sm:$0x3]  ;;  %68 = vmatpush.msra.mxu1 %v45_v0  ;;  %v96_v4 = vunpack.c.l.b16 %v82_v3 }
   0x4   :  { %69 = vmatpush.msra.mxu1 %v44_v1 }
   0x5   :  { %17 = vsyncpa [#allocation3], 0  ;;  %1355 = vmatmul.msk.f32.vlgmr.msra.gmra.mxu1 %vm50_vm0, %v43_v2  ;;  %v99_v5 = vpack.c.b16 %v96_v4, %v96_v4  ;;  %v1432_v7 = vld [vmem:[%s1926_s4 + $0x8] sm:$0xff]  ;;  %v1431_v8 = vld [vmem:[%s1926_s4] sm:$0xff]  ;;  %vm102_vm2 = vcmask 326656   ;;  %vm141_vm3 = vcmask 261120  }
   0x6   :  { %v1434_v9 = vld [vmem:[%s1927_s5 + $0x8] sm:$0xff]  ;;  %v75_v10 = vld [vmem:[%s1922_s0] sm:$0xff]  ;;  %vm646_vm0 = vcmask 1041408   ;;  %s1343_s17 = sshll.u32 %s1934_s12, 4  ;;  %s1613_s18 = smov 128   ;;  %s1344_s17 = int_to_ptr.hbm [resolvable:$true] %s1343_s17 }
   0x7   :  { %v108_v6 = vsel %vm106_vm1, %v99_v5, 0  ;;  %151 = vmatpush.bf16.msra.mxu2 %v1434_v9  ;;  %v76_v11 = vld [vmem:[%s1922_s0 + $0x8] sm:$0xff]  ;;  %209 = vmatpush.bf16.msra.mxu3 %v1434_v9  ;;  %v1433_v13 = vld [vmem:[%s1927_s5] sm:$0xff]  ;;  %s1614_s19 = smov 8  }
   0x8   :  { %115 = vmatpush.bf16.msrb.mxu1 %v108_v6  ;;  %v77_v12 = vpack.c.bf16 %v76_v11, %v75_v10  ;;  %274 = vmatpush.bf16.msra.mxu0 %v1434_v9  ;;  %v1446_v14 = vld [vmem:[%s1925_s3] ss:$0 sm:$0xff]  ;;  %s1610_s3 = smov 64  }
   0x9   :  { %v1721_v19 = vld [vmem:[%s1928_s6] ss:$0 sm:$0xff]  ;;  %s1611_s6 = smov 32  }
   0xb   :  { %152 = vmatpush.bf16.msra.mxu2 %v1433_v13  ;;  %210 = vmatpush.bf16.msra.mxu3 %v1433_v13 }
   0xc   :  { %116 = vmatpush.bf16.msrb.mxu1 %v1432_v7  ;;  %275 = vmatpush.bf16.msra.mxu0 %v1433_v13 }
   0xf   :  { %339 = vmatpush.bf16.msrb.mxu2 %v1434_v9  ;;  %404 = vmatpush.bf16.msrb.mxu3 %v1434_v9 }
  0x10   :  { %117 = vmatpush.bf16.msrb.mxu1 %v1431_v8  ;;  %465 = vmatpush.bf16.msrb.mxu0 %v1434_v9 }
  0x13   :  { %1364 = vmatmul.msk.bf16.vlgmr.msrb.gmra.mxu1 %vm102_vm2, %v77_v12  ;;  %340 = vmatpush.bf16.msrb.mxu2 %v1433_v13 }
  0x14   :  { %530 = vmatpush.bf16.msra.mxu1 %v1434_v9  ;;  %405 = vmatpush.bf16.msrb.mxu3 %v1433_v13 }
  0x15   :  { %466 = vmatpush.bf16.msrb.mxu0 %v1433_v13 }
  0x18   :  { %531 = vmatpush.bf16.msra.mxu1 %v1433_v13 }
  0x82   :  { %v71_v15 = vpop.f32.mrf.mxu1 }
  0x83   :  { %v72_v16 = vadd.f32 %v1446_v14, %v71_v15 }
  0x85   :  { %v74_v17 = vmax.f32 %v72_v16, 0.0 }
  0x87   :  { %v1714_v18 = vpack.c.bf16 %v74_v17, %v74_v17 }
  0x89   :  { %1373 = vmatmul.msk.bf16.vlgmr.msra.gmra.mxu2 %vm141_vm3, %v1714_v18 }
  0x8a   :  { %595 = vmatpush.bf16.msra.mxu2 %v1434_v9 }
  0x8e   :  { %596 = vmatpush.bf16.msra.mxu2 %v1433_v13 }
  0x90   :  { %v119_v20 = vpop.f32.mrf.mxu1 }
  0x91   :  { %v1724_v21 = vadd.f32 %v1721_v19, %v119_v20 }
 0x10c   :  { %v154_v22 = vpop.f32.mrf.mxu2 }
 0x10d   :  { %v158_v23 = vadd.f32 %v154_v22, %v1724_v21 }
 0x10f   :  { %1450 = vtanh.f32 %v158_v23  ;;  %v1374_v26 = vmul.f32 -1.442695, %v158_v23 }
 0x111   :  { %1452 = vpow2.f32 %v1374_v26 }
 0x114   :  { %v156_v24 = vpop.f32.mrf.mxu2 }
 0x115   :  { %v1451_v25 = vpop.eup %1450 }
 0x116   :  { %181 = vrot.lane.b32.xlu0 %v1451_v25, %s1610_s3 }
 0x117   :  { %v1453_v27 = vpop.eup %1452 }
 0x118   :  { %v162_v28 = vadd.f32 1.0, %v1453_v27 }
 0x11a   :  { %1454 = vrcp.f32 %v162_v28  ;;  %v174_v34 = vand.u32 2147483648, %v162_v28  ;;  %vm168_vm5 = vweird.f32 %v162_v28  ;;  %v172_v35 = vand.u32 2147483647, %v162_v28 }
 0x11c   :  { %v175_v37 = vor.u32 1.1754944e-38, %v174_v34  ;;  %vm173_vm7 = vcmp.eq.f32.partialorder %v172_v35, 8.507059e+37 }
 0x120   :  { %v1455_v29 = vpop.eup %1454 }
 0x121   :  { %v164_v30 = vmul.f32 %v1455_v29, %v162_v28  ;;  %vm169_vm4 = vweird.f32 %v1455_v29 }
 0x122   :  { %vm170_vm6 = vmor %vm168_vm5, %vm169_vm4 }
 0x123   :  { %v165_v31 = vsub.f32 1.0, %v164_v30 }
 0x125   :  { %v166_v32 = vmul.f32 %v1455_v29, %v165_v31 }
 0x127   :  { %v167_v33 = vadd.f32 %v1455_v29, %v166_v32 }
 0x129   :  { %v171_v36 = vsel %vm170_vm6, %v1455_v29, %v167_v33 }
 0x12a   :  { %v176_v39 = vsel %vm173_vm7, %v175_v37, %v171_v36  ;;  %vm649_vm7 = vcmask 1045504  }
 0x12b   :  { %v179_v41 = vmul.f32 0.0, %v176_v39 }
 0x188   :  { %v182_v38 = vpop.permute.xlu0 %181 }
 0x189   :  { %v184_v40 = vmul.f32 %v182_v38, %v176_v39 }
 0x18b   :  { %186 = vrot.lane.b32.xlu0 %v184_v40, %s1611_s6 }
 0x1fd   :  { %v187_v42 = vpop.permute.xlu0 %186 }
 0x1fe   :  { %v189_v43 = vadd.f32 %v187_v42, %v179_v41 }
 0x200   :  { %1456 = vtanh.f32 %v189_v43  ;;  %v241_v5 = vrot.slane %v189_v43, 6 }
 0x206   :  { %v1457_v44 = vpop.eup %1456 }
 0x207   :  { %192 = vrot.lane.b32.xlu1 %v1457_v44, %s1610_s3 }
 0x279   :  { %v193_v45 = vpop.permute.xlu1 %192 }
 0x27a   :  { %v1730_v46 = vmul.f32 %v193_v45, %v176_v39 }
 0x27c   :  { %v196_v47 = vpack.c.bf16 %v1730_v46, %v1730_v46 }
 0x27e   :  { %198 = vrot.lane.b32.xlu1 %v196_v47, %s1611_s6 }
 0x2f0   :  { %v199_v48 = vpop.permute.xlu1 %198 }
 0x2f1   :  { %1375 = vmatmul.msk.bf16.vlgmr.msra.gmra.mxu3 %vm141_vm3, %v199_v48 }
 0x374   :  { %v212_v49 = vpop.f32.mrf.mxu3 }
 0x375   :  { %v217_v50 = vrot.slane %v212_v49, 6 }
 0x377   :  { %v219_v51 = vadd.f32 %v217_v50, %v1724_v21 }
 0x379   :  { %1458 = vtanh.f32 %v219_v51  ;;  %v1376_v54 = vmul.f32 -1.442695, %v219_v51 }
 0x37b   :  { %1460 = vpow2.f32 %v1376_v54 }
 0x37c   :  { %v214_v52 = vpop.f32.mrf.mxu3 }
 0x37f   :  { %v1459_v53 = vpop.eup %1458 }
 0x380   :  { %245 = vrot.lane.b32.xlu2 %v1459_v53, %s1610_s3 }
 0x381   :  { %v1461_v55 = vpop.eup %1460 }
 0x382   :  { %v223_v56 = vadd.f32 1.0, %v1461_v55 }
 0x384   :  { %1462 = vrcp.f32 %v223_v56  ;;  %v235_v62 = vand.u32 2147483648, %v223_v56  ;;  %vm229_vm9 = vweird.f32 %v223_v56  ;;  %v233_v63 = vand.u32 2147483647, %v223_v56 }
 0x386   :  { %v236_v1 = vor.u32 1.1754944e-38, %v235_v62  ;;  %vm234_vm11 = vcmp.eq.f32.partialorder %v233_v63, 8.507059e+37 }
 0x38a   :  { %v1463_v57 = vpop.eup %1462 }
 0x38b   :  { %v225_v58 = vmul.f32 %v1463_v57, %v223_v56  ;;  %vm230_vm8 = vweird.f32 %v1463_v57 }
 0x38c   :  { %vm231_vm10 = vmor %vm229_vm9, %vm230_vm8 }
 0x38d   :  { %v226_v59 = vsub.f32 1.0, %v225_v58 }
 0x38f   :  { %v227_v60 = vmul.f32 %v1463_v57, %v226_v59 }
 0x391   :  { %v228_v61 = vadd.f32 %v1463_v57, %v227_v60 }
 0x393   :  { %v232_v0 = vsel %vm231_vm10, %v1463_v57, %v228_v61 }
 0x394   :  { %v237_v3 = vsel %vm234_vm11, %v236_v1, %v232_v0 }
 0x395   :  { %v243_v6 = vmul.f32 %v241_v5, %v237_v3 }
 0x3da   :  { %v246_v2 = vpop.permute.xlu2 %245 }
 0x3db   :  { %v248_v4 = vmul.f32 %v246_v2, %v237_v3 }
 0x3dd   :  { %250 = vrot.lane.b32.xlu2 %v248_v4, %s1611_s6 }
 0x437   :  { %v251_v7 = vpop.permute.xlu2 %250 }
 0x438   :  { %v253_v8 = vadd.f32 %v251_v7, %v243_v6 }
 0x43a   :  { %1464 = vtanh.f32 %v253_v8  ;;  %v306_v38 = vrot.slane %v253_v8, 6 }
 0x440   :  { %v1465_v9 = vpop.eup %1464 }
 0x441   :  { %256 = vrot.lane.b32.xlu0 %v1465_v9, %s1610_s3 }
 0x4b3   :  { %v257_v10 = vpop.permute.xlu0 %256 }
 0x4b4   :  { %v259_v11 = vmul.f32 %v257_v10, %v237_v3 }
 0x4b6   :  { %v260_v12 = vpack.c.bf16 %v259_v11, %v259_v11  ;;  %v647_v45 = vsel %vm646_vm0, %v1730_v46, %v259_v11 }
 0x4b8   :  { %v262_v13 = vrot.slane %v260_v12, 1 }
 0x4ba   :  { %263 = vrot.lane.b32.xlu1 %v262_v13, %s1611_s6 }
 0x52c   :  { %v264_v14 = vpop.permute.xlu1 %263 }
 0x52d   :  { %1377 = vmatmul.msk.bf16.vlgmr.msra.gmra.mxu0 %vm141_vm3, %v264_v14 }
 0x5aa   :  { %v277_v15 = vpop.f32.mrf.mxu0 }
 0x5ab   :  { %v282_v16 = vrot.slane %v277_v15, 4 }
 0x5ad   :  { %v284_v17 = vadd.f32 %v282_v16, %v1724_v21  ;;  %v121_v16 = vpop.f32.mrf.mxu1 }
 0x5af   :  { %1466 = vtanh.f32 %v284_v17  ;;  %v1378_v23 = vmul.f32 -1.442695, %v284_v17  ;;  %v1761_v17 = vadd.f32 %v1721_v19, %v121_v16 }
 0x5b1   :  { %1468 = vpow2.f32 %v1378_v23 }
 0x5b2   :  { %v279_v20 = vpop.f32.mrf.mxu0 }
 0x5b5   :  { %v1467_v22 = vpop.eup %1466 }
 0x5b6   :  { %310 = vrot.lane.b32.xlu2 %v1467_v22, %s1610_s3 }
 0x5b7   :  { %v1469_v24 = vpop.eup %1468 }
 0x5b8   :  { %v288_v25 = vadd.f32 1.0, %v1469_v24 }
 0x5ba   :  { %1470 = vrcp.f32 %v288_v25  ;;  %v300_v31 = vand.u32 2147483648, %v288_v25  ;;  %vm294_vm13 = vweird.f32 %v288_v25  ;;  %v298_v32 = vand.u32 2147483647, %v288_v25 }
 0x5bc   :  { %v301_v34 = vor.u32 1.1754944e-38, %v300_v31  ;;  %vm299_vm15 = vcmp.eq.f32.partialorder %v298_v32, 8.507059e+37 }
 0x5c0   :  { %v1471_v26 = vpop.eup %1470 }
 0x5c1   :  { %v290_v27 = vmul.f32 %v1471_v26, %v288_v25  ;;  %vm295_vm12 = vweird.f32 %v1471_v26 }
 0x5c2   :  { %vm296_vm14 = vmor %vm294_vm13, %vm295_vm12 }
 0x5c3   :  { %v291_v28 = vsub.f32 1.0, %v290_v27 }
 0x5c5   :  { %v292_v29 = vmul.f32 %v1471_v26, %v291_v28 }
 0x5c7   :  { %v293_v30 = vadd.f32 %v1471_v26, %v292_v29 }
 0x5c9   :  { %v297_v33 = vsel %vm296_vm14, %v1471_v26, %v293_v30 }
 0x5ca   :  { %v302_v36 = vsel %vm299_vm15, %v301_v34, %v297_v33 }
 0x5cb   :  { %v308_v39 = vmul.f32 %v306_v38, %v302_v36 }
 0x610   :  { %v311_v35 = vpop.permute.xlu2 %310 }
 0x611   :  { %v313_v37 = vmul.f32 %v311_v35, %v302_v36 }
 0x613   :  { %315 = vrot.lane.b32.xlu0 %v313_v37, %s1611_s6 }
 0x685   :  { %v316_v40 = vpop.permute.xlu0 %315 }
 0x686   :  { %v318_v41 = vadd.f32 %v316_v40, %v308_v39 }
 0x688   :  { %1472 = vtanh.f32 %v318_v41  ;;  %v371_v5 = vrot.slane %v318_v41, 6 }
 0x68e   :  { %v1473_v42 = vpop.eup %1472 }
 0x68f   :  { %321 = vrot.lane.b32.xlu1 %v1473_v42, %s1610_s3 }
 0x701   :  { %v322_v43 = vpop.permute.xlu1 %321 }
 0x702   :  { %v324_v44 = vmul.f32 %v322_v43, %v302_v36 }
 0x704   :  { %v325_v47 = vpack.c.bf16 %v324_v44, %v324_v44  ;;  %v648_v48 = vsel %vm106_vm1, %v647_v45, %v324_v44 }
 0x706   :  { %v327_v49 = vrot.slane %v325_v47, 2 }
 0x708   :  { %328 = vrot.lane.b32.xlu2 %v327_v49, %s1611_s6  ;;  %v1781_v49 = vld [vmem:[%s1930_s8] sm:$0xff] }
 0x762   :  { %v329_v50 = vpop.permute.xlu2 %328 }
 0x763   :  { %1379 = vmatmul.msk.bf16.vlgmr.msrb.gmra.mxu2 %vm141_vm3, %v329_v50 }
 0x7e6   :  { %v342_v51 = vpop.f32.mrf.mxu2 }
 0x7e7   :  { %v347_v52 = vrot.slane %v342_v51, 2 }
 0x7e9   :  { %v349_v53 = vadd.f32 %v347_v52, %v1724_v21 }
 0x7eb   :  { %1474 = vtanh.f32 %v349_v53  ;;  %v1380_v56 = vmul.f32 -1.442695, %v349_v53 }
 0x7ed   :  { %1476 = vpow2.f32 %v1380_v56 }
 0x7ee   :  { %v344_v54 = vpop.f32.mrf.mxu2 }
 0x7f1   :  { %v1475_v55 = vpop.eup %1474 }
 0x7f2   :  { %375 = vrot.lane.b32.xlu0 %v1475_v55, %s1610_s3 }
 0x7f3   :  { %v1477_v46 = vpop.eup %1476 }
 0x7f4   :  { %v353_v57 = vadd.f32 1.0, %v1477_v46 }
 0x7f6   :  { %1478 = vrcp.f32 %v353_v57  ;;  %v365_v63 = vand.u32 2147483648, %v353_v57  ;;  %vm359_vm4 = vweird.f32 %v353_v57  ;;  %v363_v0 = vand.u32 2147483647, %v353_v57 }
 0x7f8   :  { %v366_v1 = vor.u32 1.1754944e-38, %v365_v63  ;;  %vm364_vm6 = vcmp.eq.f32.partialorder %v363_v0, 8.507059e+37 }
 0x7fc   :  { %v1479_v58 = vpop.eup %1478 }
 0x7fd   :  { %v355_v59 = vmul.f32 %v1479_v58, %v353_v57  ;;  %vm360_vm2 = vweird.f32 %v1479_v58 }
 0x7fe   :  { %vm361_vm5 = vmor %vm359_vm4, %vm360_vm2 }
 0x7ff   :  { %v356_v60 = vsub.f32 1.0, %v355_v59 }
 0x801   :  { %v357_v61 = vmul.f32 %v1479_v58, %v356_v60 }
 0x803   :  { %v358_v62 = vadd.f32 %v1479_v58, %v357_v61 }
 0x805   :  { %v362_v21 = vsel %vm361_vm5, %v1479_v58, %v358_v62 }
 0x806   :  { %v367_v3 = vsel %vm364_vm6, %v366_v1, %v362_v21 }
 0x807   :  { %v373_v6 = vmul.f32 %v371_v5, %v367_v3 }
 0x864   :  { %v376_v2 = vpop.permute.xlu0 %375 }
 0x865   :  { %v378_v4 = vmul.f32 %v376_v2, %v367_v3 }
 0x867   :  { %380 = vrot.lane.b32.xlu1 %v378_v4, %s1611_s6 }
 0x8d9   :  { %v381_v7 = vpop.permute.xlu1 %380 }
 0x8da   :  { %v383_v8 = vadd.f32 %v381_v7, %v373_v6 }
 0x8dc   :  { %1480 = vtanh.f32 %v383_v8  ;;  %v433_v39 = vrot.slane %v383_v8, 6 }
 0x8e2   :  { %v1481_v9 = vpop.eup %1480 }
 0x8e3   :  { %386 = vrot.lane.b32.xlu2 %v1481_v9, %s1610_s3 }
 0x93d   :  { %v387_v10 = vpop.permute.xlu2 %386 }
 0x93e   :  { %v389_v11 = vmul.f32 %v387_v10, %v367_v3 }
 0x940   :  { %v390_v12 = vpack.c.bf16 %v389_v11, %v389_v11  ;;  %v1756_v13 = vsel %vm649_vm7, %v648_v48, %v389_v11  ;;  %v1775_v48 = vld [vmem:[%s1930_s8 + $0x8] sm:$0xff] }
 0x941   :  { %717 = vmatpush.bf16.msra.mxu0 %v1775_v48  ;;  %775 = vmatpush.bf16.msrb.mxu1 %v1775_v48 }
 0x942   :  { %v392_v14 = vrot.slane %v390_v12, 3  ;;  %840 = vmatpush.bf16.msrb.mxu2 %v1775_v48 }
 0x944   :  { %393 = vrot.lane.b32.xlu0 %v392_v14, %s1611_s6 }
 0x945   :  { %718 = vmatpush.bf16.msra.mxu0 %v1781_v49  ;;  %776 = vmatpush.bf16.msrb.mxu1 %v1781_v49 }
 0x946   :  { %841 = vmatpush.bf16.msrb.mxu2 %v1781_v49 }
 0x9b6   :  { %v394_v15 = vpop.permute.xlu0 %393 }
 0x9b7   :  { %1381 = vmatmul.msk.bf16.vlgmr.msrb.gmra.mxu3 %vm141_vm3, %v394_v15 }
 0xa3a   :  { %v407_v20 = vpop.f32.mrf.mxu3 }
 0xa3b   :  { %v411_v22 = vadd.f32 %v407_v20, %v1761_v17 }
 0xa3d   :  { %1482 = vtanh.f32 %v411_v22  ;;  %v1382_v25 = vmul.f32 -1.442695, %v411_v22 }
 0xa3f   :  { %1484 = vpow2.f32 %v1382_v25 }
 0xa42   :  { %v409_v23 = vpop.f32.mrf.mxu3 }
 0xa43   :  { %v1483_v24 = vpop.eup %1482 }
 0xa44   :  { %437 = vrot.lane.b32.xlu1 %v1483_v24, %s1610_s3 }
 0xa45   :  { %v1485_v26 = vpop.eup %1484 }
 0xa46   :  { %v415_v27 = vadd.f32 1.0, %v1485_v26 }
 0xa48   :  { %1486 = vrcp.f32 %v415_v27  ;;  %v427_v19 = vand.u32 2147483648, %v415_v27  ;;  %vm421_vm9 = vweird.f32 %v415_v27  ;;  %v425_v33 = vand.u32 2147483647, %v415_v27 }
 0xa4a   :  { %v428_v35 = vor.u32 1.1754944e-38, %v427_v19  ;;  %vm426_vm11 = vcmp.eq.f32.partialorder %v425_v33, 8.507059e+37 }
 0xa4e   :  { %v1487_v28 = vpop.eup %1486 }
 0xa4f   :  { %v417_v29 = vmul.f32 %v1487_v28, %v415_v27  ;;  %vm422_vm8 = vweird.f32 %v1487_v28 }
 0xa50   :  { %vm423_vm10 = vmor %vm421_vm9, %vm422_vm8 }
 0xa51   :  { %v418_v30 = vsub.f32 1.0, %v417_v29 }
 0xa53   :  { %v419_v31 = vmul.f32 %v1487_v28, %v418_v30 }
 0xa55   :  { %v420_v32 = vadd.f32 %v1487_v28, %v419_v31 }
 0xa57   :  { %v424_v34 = vsel %vm423_vm10, %v1487_v28, %v420_v32 }
 0xa58   :  { %v429_v37 = vsel %vm426_vm11, %v428_v35, %v424_v34 }
 0xa59   :  { %v435_v40 = vmul.f32 %v433_v39, %v429_v37 }
 0xab6   :  { %v438_v36 = vpop.permute.xlu1 %437 }
 0xab7   :  { %v440_v38 = vmul.f32 %v438_v36, %v429_v37 }
 0xab9   :  { %442 = vrot.lane.b32.xlu2 %v440_v38, %s1611_s6 }
 0xb13   :  { %v443_v41 = vpop.permute.xlu2 %442 }
 0xb14   :  { %v445_v42 = vadd.f32 %v443_v41, %v435_v40 }
 0xb16   :  { %1488 = vtanh.f32 %v445_v42  ;;  %v497_v6 = vrot.slane %v445_v42, 6 }
 0xb1c   :  { %v1489_v43 = vpop.eup %1488 }
 0xb1d   :  { %448 = vrot.lane.b32.xlu0 %v1489_v43, %s1610_s3 }
 0xb8f   :  { %v449_v44 = vpop.permute.xlu0 %448 }
 0xb90   :  { %v1767_v45 = vmul.f32 %v449_v44, %v429_v37 }
 0xb92   :  { %v452_v47 = vpack.c.bf16 %v1767_v45, %v1767_v45 }
 0xb94   :  { %454 = vrot.lane.b32.xlu1 %v452_v47, %s1611_s6 }
 0xc06   :  { %v455_v50 = vpop.permute.xlu1 %454 }
 0xc07   :  { %1383 = vmatmul.msk.bf16.vlgmr.msrb.gmra.mxu0 %vm141_vm3, %v455_v50 }
 0xc08   :  { %970 = vmatpush.bf16.msrb.mxu0 %v1775_v48 }
 0xc0c   :  { %971 = vmatpush.bf16.msrb.mxu0 %v1781_v49 }
 0xc17   :  { %1406 = vmatmul.msk.bf16.vlgmr.msra.gmra.mxu0 %vm141_vm3, %v1714_v18 }
 0xc84   :  { %v468_v51 = vpop.f32.mrf.mxu0 }
 0xc85   :  { %v473_v52 = vrot.slane %v468_v51, 6 }
 0xc87   :  { %v475_v53 = vadd.f32 %v473_v52, %v1761_v17 }
 0xc89   :  { %1490 = vtanh.f32 %v475_v53  ;;  %v1384_v57 = vmul.f32 -1.442695, %v475_v53 }
 0xc8b   :  { %1492 = vpow2.f32 %v1384_v57 }
 0xc8c   :  { %v470_v54 = vpop.f32.mrf.mxu0 }
 0xc8f   :  { %v1491_v55 = vpop.eup %1490 }
 0xc90   :  { %501 = vrot.lane.b32.xlu2 %v1491_v55, %s1610_s3 }
 0xc91   :  { %v1493_v58 = vpop.eup %1492 }
 0xc92   :  { %v479_v59 = vadd.f32 1.0, %v1493_v58 }
 0xc94   :  { %v1795_v56 = vpop.f32.mrf.mxu0  ;;  %1494 = vrcp.f32 %v479_v59  ;;  %v491_v0 = vand.u32 2147483648, %v479_v59  ;;  %vm485_vm13 = vweird.f32 %v479_v59  ;;  %v489_v21 = vand.u32 2147483647, %v479_v59 }
 0xc96   :  { %v492_v2 = vor.u32 1.1754944e-38, %v491_v0  ;;  %vm490_vm15 = vcmp.eq.f32.partialorder %v489_v21, 8.507059e+37 }
 0xc9a   :  { %v1495_v60 = vpop.eup %1494 }
 0xc9b   :  { %v481_v61 = vmul.f32 %v1495_v60, %v479_v59  ;;  %vm486_vm12 = vweird.f32 %v1495_v60 }
 0xc9c   :  { %v722_v46 = vpop.f32.mrf.mxu0  ;;  %vm487_vm14 = vmor %vm485_vm13, %vm486_vm12 }
 0xc9d   :  { %v482_v18 = vsub.f32 1.0, %v481_v61 }
 0xc9f   :  { %v483_v62 = vmul.f32 %v1495_v60, %v482_v18 }
 0xca1   :  { %v484_v63 = vadd.f32 %v1495_v60, %v483_v62 }
 0xca3   :  { %v488_v1 = vsel %vm487_vm14, %v1495_v60, %v484_v63 }
 0xca4   :  { %v493_v4 = vsel %vm490_vm15, %v492_v2, %v488_v1 }
 0xca5   :  { %v499_v7 = vmul.f32 %v497_v6, %v493_v4 }
 0xcea   :  { %v502_v3 = vpop.permute.xlu2 %501 }
 0xceb   :  { %v504_v5 = vmul.f32 %v502_v3, %v493_v4 }
 0xced   :  { %506 = vrot.lane.b32.xlu0 %v504_v5, %s1611_s6 }
 0xd5f   :  { %v507_v8 = vpop.permute.xlu0 %506 }
 0xd60   :  { %v509_v9 = vadd.f32 %v507_v8, %v499_v7 }
 0xd62   :  { %1496 = vtanh.f32 %v509_v9  ;;  %v562_v40 = vrot.slane %v509_v9, 6 }
 0xd68   :  { %v1497_v10 = vpop.eup %1496 }
 0xd69   :  { %512 = vrot.lane.b32.xlu1 %v1497_v10, %s1610_s3 }
 0xddb   :  { %v513_v11 = vpop.permute.xlu1 %512 }
 0xddc   :  { %v515_v12 = vmul.f32 %v513_v11, %v493_v4 }
 0xdde   :  { %v516_v14 = vpack.c.bf16 %v515_v12, %v515_v12  ;;  %v651_v51 = vsel %vm646_vm0, %v1767_v45, %v515_v12 }
 0xde0   :  { %v518_v15 = vrot.slane %v516_v14, 1  ;;  %v1436_v14 = vld [vmem:[%s1929_s7 + $0x8] sm:$0xff] }
 0xde1   :  { %687 = vmatpush.bf16.msra.mxu3 %v1436_v14 }
 0xde2   :  { %519 = vrot.lane.b32.xlu2 %v518_v15, %s1611_s6  ;;  %v1435_v15 = vld [vmem:[%s1929_s7] sm:$0xff] }
 0xde5   :  { %688 = vmatpush.bf16.msra.mxu3 %v1435_v15 }
 0xde9   :  { %905 = vmatpush.bf16.msrb.mxu3 %v1775_v48 }
 0xded   :  { %906 = vmatpush.bf16.msrb.mxu3 %v1781_v49 }
 0xe3c   :  { %v520_v16 = vpop.permute.xlu2 %519 }
 0xe3d   :  { %1385 = vmatmul.msk.bf16.vlgmr.msra.gmra.mxu1 %vm141_vm3, %v520_v16 }
 0xe3e   :  { %1031 = vmatpush.bf16.msra.mxu1 %v1775_v48 }
 0xe42   :  { %1032 = vmatpush.bf16.msra.mxu1 %v1781_v49 }
 0xeba   :  { %v533_v20 = vpop.f32.mrf.mxu1 }
 0xebb   :  { %v538_v22 = vrot.slane %v533_v20, 4 }
 0xebd   :  { %v540_v23 = vadd.f32 %v538_v22, %v1761_v17 }
 0xebf   :  { %1498 = vtanh.f32 %v540_v23  ;;  %v1386_v26 = vmul.f32 -1.442695, %v540_v23 }
 0xec1   :  { %1500 = vpow2.f32 %v1386_v26 }
 0xec2   :  { %v535_v24 = vpop.f32.mrf.mxu1 }
 0xec5   :  { %v1499_v25 = vpop.eup %1498 }
 0xec6   :  { %566 = vrot.lane.b32.xlu0 %v1499_v25, %s1610_s3  ;;  %v1835_v25 = vld [vmem:[%s1931_s9] ss:$0 sm:$0xff] }
 0xec7   :  { %v1501_v27 = vpop.eup %1500 }
 0xec8   :  { %v544_v28 = vadd.f32 1.0, %v1501_v27 }
 0xeca   :  { %1502 = vrcp.f32 %v544_v28  ;;  %v556_v33 = vand.u32 2147483648, %v544_v28  ;;  %vm550_vm4 = vweird.f32 %v544_v28  ;;  %v554_v34 = vand.u32 2147483647, %v544_v28 }
 0xecc   :  { %v557_v36 = vor.u32 1.1754944e-38, %v556_v33  ;;  %vm555_vm6 = vcmp.eq.f32.partialorder %v554_v34, 8.507059e+37 }
 0xed0   :  { %v1503_v29 = vpop.eup %1502 }
 0xed1   :  { %v546_v30 = vmul.f32 %v1503_v29, %v544_v28  ;;  %vm551_vm2 = vweird.f32 %v1503_v29 }
 0xed2   :  { %vm552_vm5 = vmor %vm550_vm4, %vm551_vm2 }
 0xed3   :  { %v547_v31 = vsub.f32 1.0, %v546_v30 }
 0xed5   :  { %v548_v32 = vmul.f32 %v1503_v29, %v547_v31 }
 0xed7   :  { %v549_v19 = vadd.f32 %v1503_v29, %v548_v32 }
 0xed9   :  { %v553_v35 = vsel %vm552_vm5, %v1503_v29, %v549_v19 }
 0xeda   :  { %v558_v38 = vsel %vm555_vm6, %v557_v36, %v553_v35 }
 0xedb   :  { %v564_v41 = vmul.f32 %v562_v40, %v558_v38 }
 0xf38   :  { %v567_v37 = vpop.permute.xlu0 %566 }
 0xf39   :  { %v569_v39 = vmul.f32 %v567_v37, %v558_v38 }
 0xf3b   :  { %571 = vrot.lane.b32.xlu1 %v569_v39, %s1611_s6 }
 0xfad   :  { %v572_v42 = vpop.permute.xlu1 %571 }
 0xfae   :  { %v574_v43 = vadd.f32 %v572_v42, %v564_v41 }
 0xfb0   :  { %1504 = vtanh.f32 %v574_v43  ;;  %v627_v8 = vrot.slane %v574_v43, 6 }
 0xfb6   :  { %v1505_v44 = vpop.eup %1504 }
 0xfb7   :  { %577 = vrot.lane.b32.xlu2 %v1505_v44, %s1610_s3 }
0x1011   :  { %v578_v47 = vpop.permute.xlu2 %577 }
0x1012   :  { %v580_v50 = vmul.f32 %v578_v47, %v558_v38 }
0x1014   :  { %v581_v52 = vpack.c.bf16 %v580_v50, %v580_v50  ;;  %v652_v53 = vsel %vm106_vm1, %v651_v51, %v580_v50 }
0x1016   :  { %v583_v54 = vrot.slane %v581_v52, 2 }
0x1018   :  { %584 = vrot.lane.b32.xlu0 %v583_v54, %s1611_s6 }
0x108a   :  { %v585_v55 = vpop.permute.xlu0 %584 }
0x108b   :  { %1387 = vmatmul.msk.bf16.vlgmr.msra.gmra.mxu2 %vm141_vm3, %v585_v55 }
0x108c   :  { %1096 = vmatpush.bf16.msra.mxu2 %v1775_v48 }
0x1090   :  { %1097 = vmatpush.bf16.msra.mxu2 %v1781_v49 }
0x110e   :  { %v598_v46 = vpop.f32.mrf.mxu2 }
0x110f   :  { %v603_v57 = vrot.slane %v598_v46, 2 }
0x1111   :  { %v605_v58 = vadd.f32 %v603_v57, %v1761_v17 }
0x1113   :  { %1506 = vtanh.f32 %v605_v58  ;;  %v1388_v60 = vmul.f32 -1.442695, %v605_v58 }
0x1115   :  { %1508 = vpow2.f32 %v1388_v60 }
0x1116   :  { %v600_v59 = vpop.f32.mrf.mxu2 }
0x1119   :  { %v1507_v45 = vpop.eup %1506 }
0x111a   :  { %631 = vrot.lane.b32.xlu1 %v1507_v45, %s1610_s3 }
0x111b   :  { %v1509_v61 = vpop.eup %1508 }
0x111c   :  { %v609_v18 = vadd.f32 1.0, %v1509_v61 }
0x111e   :  { %1510 = vrcp.f32 %v609_v18  ;;  %v621_v2 = vand.u32 2147483648, %v609_v18  ;;  %vm615_vm9 = vweird.f32 %v609_v18  ;;  %v619_v3 = vand.u32 2147483647, %v609_v18 }
0x1120   :  { %v622_v4 = vor.u32 1.1754944e-38, %v621_v2  ;;  %vm620_vm11 = vcmp.eq.f32.partialorder %v619_v3, 8.507059e+37 }
0x1124   :  { %v1511_v62 = vpop.eup %1510 }
0x1125   :  { %v611_v63 = vmul.f32 %v1511_v62, %v609_v18  ;;  %vm616_vm8 = vweird.f32 %v1511_v62 }
0x1126   :  { %vm617_vm10 = vmor %vm615_vm9, %vm616_vm8 }
0x1127   :  { %v612_v0 = vsub.f32 1.0, %v611_v63 }
0x1129   :  { %v613_v21 = vmul.f32 %v1511_v62, %v612_v0 }
0x112b   :  { %v614_v1 = vadd.f32 %v1511_v62, %v613_v21 }
0x112d   :  { %v618_v17 = vsel %vm617_vm10, %v1511_v62, %v614_v1 }
0x112e   :  { %v623_v6 = vsel %vm620_vm11, %v622_v4, %v618_v17 }
0x112f   :  { %v629_v9 = vmul.f32 %v627_v8, %v623_v6 }
0x118c   :  { %v632_v5 = vpop.permute.xlu1 %631 }
0x118d   :  { %v634_v7 = vmul.f32 %v632_v5, %v623_v6 }
0x118f   :  { %636 = vrot.lane.b32.xlu2 %v634_v7, %s1611_s6 }
0x11e9   :  { %v637_v10 = vpop.permute.xlu2 %636 }
0x11ea   :  { %v639_v11 = vadd.f32 %v637_v10, %v629_v9 }
0x11ec   :  { %1512 = vtanh.f32 %v639_v11 }
0x11f2   :  { %v1513_v12 = vpop.eup %1512 }
0x11f3   :  { %642 = vrot.lane.b32.xlu0 %v1513_v12, %s1610_s3 }
0x1265   :  { %v643_v16 = vpop.permute.xlu0 %642 }
0x1266   :  { %v645_v20 = vmul.f32 %v643_v16, %v623_v6 }
0x1268   :  { %v653_v22 = vsel %vm649_vm7, %v652_v53, %v645_v20 }
0x1269   :  { %v654_v23 = vpack.c.bf16 %v653_v22, %v1756_v13 }
0x126b   :  { %664 = vrot.lane.b32.xlu1 %v654_v23, %s1611_s6 }
0x12dd   :  { %v665_v24 = vpop.permute.xlu1 %664 }
0x12de   :  { %1397 = vmatmul.msk.bf16.vlgmr.msra.gmra.mxu3 %vm141_vm3, %v665_v24 }
0x12df   :  { %1161 = vmatpush.bf16.msra.mxu3 %v1775_v48 }
0x12e3   :  { %1162 = vmatpush.bf16.msra.mxu3 %v1781_v49 }
0x1361   :  { %v690_v26 = vpop.f32.mrf.mxu3 }
0x1362   :  { %v1838_v27 = vadd.f32 %v1835_v25, %v690_v26 }
0x1364   :  { %v724_v13 = vadd.f32 %v1795_v56, %v1838_v27 }
0x1366   :  { %1514 = vtanh.f32 %v724_v13  ;;  %v1407_v29 = vmul.f32 -1.442695, %v724_v13 }
0x1368   :  { %1516 = vpow2.f32 %v1407_v29 }
0x136c   :  { %v1515_v28 = vpop.eup %1514 }
0x136d   :  { %747 = vrot.lane.b32.xlu2 %v1515_v28, %s1610_s3 }
0x136e   :  { %v1517_v48 = vpop.eup %1516 }
0x136f   :  { %v728_v49 = vadd.f32 1.0, %v1517_v48 }
0x1371   :  { %1518 = vrcp.f32 %v728_v49  ;;  %v740_v34 = vand.u32 2147483648, %v728_v49  ;;  %vm734_vm13 = vweird.f32 %v728_v49  ;;  %v738_v35 = vand.u32 2147483647, %v728_v49 }
0x1373   :  { %v741_v36 = vor.u32 1.1754944e-38, %v740_v34  ;;  %vm739_vm15 = vcmp.eq.f32.partialorder %v738_v35, 8.507059e+37 }
0x1377   :  { %v1519_v30 = vpop.eup %1518 }
0x1378   :  { %v730_v31 = vmul.f32 %v1519_v30, %v728_v49  ;;  %vm735_vm12 = vweird.f32 %v1519_v30 }
0x1379   :  { %vm736_vm14 = vmor %vm734_vm13, %vm735_vm12  ;;  %vm1248_vm12 = vcmask 1040384  }
0x137a   :  { %v731_v32 = vsub.f32 1.0, %v730_v31 }
0x137c   :  { %v732_v19 = vmul.f32 %v1519_v30, %v731_v32 }
0x137e   :  { %v733_v33 = vadd.f32 %v1519_v30, %v732_v19 }
0x1380   :  { %v737_v56 = vsel %vm736_vm14, %v1519_v30, %v733_v33 }
0x1381   :  { %v742_v38 = vsel %vm739_vm15, %v741_v36, %v737_v56 }
0x1382   :  { %v745_v40 = vmul.f32 0.0, %v742_v38 }
0x13c7   :  { %v748_v37 = vpop.permute.xlu2 %747 }
0x13c8   :  { %v750_v39 = vmul.f32 %v748_v37, %v742_v38 }
0x13ca   :  { %752 = vrot.lane.b32.xlu0 %v750_v39, %s1611_s6 }
0x143c   :  { %v753_v41 = vpop.permute.xlu0 %752 }
0x143d   :  { %v755_v42 = vadd.f32 %v753_v41, %v745_v40 }
0x143f   :  { %1520 = vtanh.f32 %v755_v42  ;;  %v807_v4 = vrot.slane %v755_v42, 6 }
0x1445   :  { %v1521_v43 = vpop.eup %1520 }
0x1446   :  { %758 = vrot.lane.b32.xlu1 %v1521_v43, %s1610_s3 }
0x14b8   :  { %v759_v44 = vpop.permute.xlu1 %758 }
0x14b9   :  { %v1845_v47 = vmul.f32 %v759_v44, %v742_v38 }
0x14bb   :  { %v762_v50 = vpack.c.bf16 %v1845_v47, %v1845_v47 }
0x14bd   :  { %764 = vrot.lane.b32.xlu2 %v762_v50, %s1611_s6  ;;  %v1234_v50 = vrot.slane %v1845_v47, 1 }
0x1517   :  { %v765_v51 = vpop.permute.xlu2 %764 }
0x1518   :  { %1408 = vmatmul.msk.bf16.vlgmr.msrb.gmra.mxu1 %vm141_vm3, %v765_v51 }
0x1595   :  { %v778_v52 = vpop.f32.mrf.mxu1 }
0x1596   :  { %v783_v53 = vrot.slane %v778_v52, 6 }
0x1598   :  { %v785_v54 = vadd.f32 %v783_v53, %v1838_v27 }
0x159a   :  { %1522 = vtanh.f32 %v785_v54  ;;  %v1409_v57 = vmul.f32 -1.442695, %v785_v54 }
0x159c   :  { %1524 = vpow2.f32 %v1409_v57 }
0x159d   :  { %v780_v55 = vpop.f32.mrf.mxu1 }
0x15a0   :  { %v1523_v46 = vpop.eup %1522 }
0x15a1   :  { %811 = vrot.lane.b32.xlu0 %v1523_v46, %s1610_s3 }
0x15a2   :  { %v1525_v58 = vpop.eup %1524 }
0x15a3   :  { %v789_v59 = vadd.f32 1.0, %v1525_v58 }
0x15a5   :  { %1526 = vrcp.f32 %v789_v59  ;;  %v801_v63 = vand.u32 2147483648, %v789_v59  ;;  %vm795_vm4 = vweird.f32 %v789_v59  ;;  %v799_v0 = vand.u32 2147483647, %v789_v59 }
0x15a7   :  { %v802_v1 = vor.u32 1.1754944e-38, %v801_v63  ;;  %vm800_vm6 = vcmp.eq.f32.partialorder %v799_v0, 8.507059e+37 }
0x15ab   :  { %v1527_v45 = vpop.eup %1526 }
0x15ac   :  { %v791_v60 = vmul.f32 %v1527_v45, %v789_v59  ;;  %vm796_vm2 = vweird.f32 %v1527_v45 }
0x15ad   :  { %vm797_vm5 = vmor %vm795_vm4, %vm796_vm2  ;;  %vm1251_vm2 = vcmask 1042432  }
0x15ae   :  { %v792_v61 = vsub.f32 1.0, %v791_v60 }
0x15b0   :  { %v793_v18 = vmul.f32 %v1527_v45, %v792_v61 }
0x15b2   :  { %v794_v62 = vadd.f32 %v1527_v45, %v793_v18 }
0x15b4   :  { %v798_v21 = vsel %vm797_vm5, %v1527_v45, %v794_v62  ;;  %v692_v45 = vpop.f32.mrf.mxu3 }
0x15b5   :  { %v803_v3 = vsel %vm800_vm6, %v802_v1, %v798_v21 }
0x15b6   :  { %v809_v5 = vmul.f32 %v807_v4, %v803_v3 }
0x1613   :  { %v812_v2 = vpop.permute.xlu0 %811 }
0x1614   :  { %v814_v17 = vmul.f32 %v812_v2, %v803_v3 }
0x1616   :  { %816 = vrot.lane.b32.xlu1 %v814_v17, %s1611_s6 }
0x1688   :  { %v817_v6 = vpop.permute.xlu1 %816 }
0x1689   :  { %v819_v7 = vadd.f32 %v817_v6, %v809_v5 }
0x168b   :  { %1528 = vtanh.f32 %v819_v7  ;;  %v872_v36 = vrot.slane %v819_v7, 6 }
0x1691   :  { %v1529_v8 = vpop.eup %1528 }
0x1692   :  { %822 = vrot.lane.b32.xlu2 %v1529_v8, %s1610_s3 }
0x16ec   :  { %v823_v9 = vpop.permute.xlu2 %822 }
0x16ed   :  { %v825_v10 = vmul.f32 %v823_v9, %v803_v3 }
0x16ef   :  { %v826_v11 = vpack.c.bf16 %v825_v10, %v825_v10  ;;  %v1213_v41 = vrot.slane %v825_v10, 1  ;;  %v1236_v42 = vrot.slane %v825_v10, 2 }
0x16f1   :  { %v828_v12 = vrot.slane %v826_v11, 1  ;;  %v1249_v54 = vsel %vm1248_vm12, %v1845_v47, %v1213_v41  ;;  %v1259_v55 = vsel %vm1248_vm12, %v1234_v50, %v1236_v42  ;;  %vm1254_vm12 = vcmask 1044480  }
0x16f3   :  { %829 = vrot.lane.b32.xlu0 %v828_v12, %s1611_s6 }
0x1765   :  { %v830_v14 = vpop.permute.xlu0 %829 }
0x1766   :  { %1410 = vmatmul.msk.bf16.vlgmr.msrb.gmra.mxu2 %vm141_vm3, %v830_v14 }
0x17e9   :  { %v843_v15 = vpop.f32.mrf.mxu2 }
0x17ea   :  { %v848_v16 = vrot.slane %v843_v15, 4 }
0x17ec   :  { %v850_v20 = vadd.f32 %v848_v16, %v1838_v27 }
0x17ee   :  { %1530 = vtanh.f32 %v850_v20  ;;  %v1411_v24 = vmul.f32 -1.442695, %v850_v20 }
0x17f0   :  { %1532 = vpow2.f32 %v1411_v24 }
0x17f1   :  { %v845_v22 = vpop.f32.mrf.mxu2 }
0x17f4   :  { %v1531_v23 = vpop.eup %1530 }
0x17f5   :  { %876 = vrot.lane.b32.xlu1 %v1531_v23, %s1610_s3 }
0x17f6   :  { %v1533_v26 = vpop.eup %1532 }
0x17f7   :  { %v854_v13 = vadd.f32 1.0, %v1533_v26 }
0x17f9   :  { %1534 = vrcp.f32 %v854_v13  ;;  %v866_v31 = vand.u32 2147483648, %v854_v13  ;;  %vm860_vm9 = vweird.f32 %v854_v13  ;;  %v864_v32 = vand.u32 2147483647, %v854_v13 }
0x17fb   :  { %v867_v33 = vor.u32 1.1754944e-38, %v866_v31  ;;  %vm865_vm11 = vcmp.eq.f32.partialorder %v864_v32, 8.507059e+37 }
0x17ff   :  { %v1535_v28 = vpop.eup %1534 }
0x1800   :  { %v856_v29 = vmul.f32 %v1535_v28, %v854_v13  ;;  %vm861_vm8 = vweird.f32 %v1535_v28 }
0x1801   :  { %vm862_vm10 = vmor %vm860_vm9, %vm861_vm8 }
0x1802   :  { %v857_v48 = vsub.f32 1.0, %v856_v29 }
0x1804   :  { %v858_v49 = vmul.f32 %v1535_v28, %v857_v48 }
0x1806   :  { %v859_v30 = vadd.f32 %v1535_v28, %v858_v49  ;;  %v1874_v49 = vadd.f32 %v1835_v25, %v692_v45 }
0x1808   :  { %v863_v19 = vsel %vm862_vm10, %v1535_v28, %v859_v30 }
0x1809   :  { %v868_v35 = vsel %vm865_vm11, %v867_v33, %v863_v19 }
0x180a   :  { %v874_v37 = vmul.f32 %v872_v36, %v868_v35 }
0x1867   :  { %v877_v34 = vpop.permute.xlu1 %876 }
0x1868   :  { %v879_v56 = vmul.f32 %v877_v34, %v868_v35 }
0x186a   :  { %881 = vrot.lane.b32.xlu2 %v879_v56, %s1611_s6 }
0x18c4   :  { %v882_v38 = vpop.permute.xlu2 %881 }
0x18c5   :  { %v884_v39 = vadd.f32 %v882_v38, %v874_v37 }
0x18c7   :  { %1536 = vtanh.f32 %v884_v39  ;;  %v937_v11 = vrot.slane %v884_v39, 6 }
0x18cd   :  { %v1537_v40 = vpop.eup %1536 }
0x18ce   :  { %887 = vrot.lane.b32.xlu0 %v1537_v40, %s1610_s3 }
0x1940   :  { %v888_v43 = vpop.permute.xlu0 %887 }
0x1941   :  { %v890_v44 = vmul.f32 %v888_v43, %v868_v35 }
0x1943   :  { %v1216_v51 = vrot.slane %v890_v44, 2  ;;  %v1238_v52 = vrot.slane %v890_v44, 3  ;;  %v891_v53 = vpack.c.bf16 %v890_v44, %v890_v44 }
0x1945   :  { %v1250_v46 = vsel %vm646_vm0, %v1249_v54, %v1216_v51  ;;  %v1260_v57 = vsel %vm646_vm0, %v1259_v55, %v1238_v52  ;;  %v893_v58 = vrot.slane %v891_v53, 2 }
0x1947   :  { %894 = vrot.lane.b32.xlu1 %v893_v58, %s1611_s6 }
0x19b9   :  { %v895_v59 = vpop.permute.xlu1 %894 }
0x19ba   :  { %1412 = vmatmul.msk.bf16.vlgmr.msrb.gmra.mxu3 %vm141_vm3, %v895_v59 }
0x1a3d   :  { %v908_v60 = vpop.f32.mrf.mxu3 }
0x1a3e   :  { %v913_v61 = vrot.slane %v908_v60, 2 }
0x1a40   :  { %v915_v18 = vadd.f32 %v913_v61, %v1838_v27 }
0x1a42   :  { %1538 = vtanh.f32 %v915_v18  ;;  %v1413_v47 = vmul.f32 -1.442695, %v915_v18 }
0x1a44   :  { %1540 = vpow2.f32 %v1413_v47 }
0x1a45   :  { %v910_v62 = vpop.f32.mrf.mxu3 }
0x1a48   :  { %v1539_v63 = vpop.eup %1538 }
0x1a49   :  { %941 = vrot.lane.b32.xlu2 %v1539_v63, %s1610_s3 }
0x1a4a   :  { %v1541_v0 = vpop.eup %1540 }
0x1a4b   :  { %v919_v21 = vadd.f32 1.0, %v1541_v0 }
0x1a4d   :  { %1542 = vrcp.f32 %v919_v21  ;;  %v931_v5 = vand.u32 2147483648, %v919_v21  ;;  %vm925_vm13 = vweird.f32 %v919_v21  ;;  %v929_v6 = vand.u32 2147483647, %v919_v21 }
0x1a4f   :  { %v932_v7 = vor.u32 1.1754944e-38, %v931_v5  ;;  %vm930_vm15 = vcmp.eq.f32.partialorder %v929_v6, 8.507059e+37 }
0x1a53   :  { %v1543_v1 = vpop.eup %1542 }
0x1a54   :  { %v921_v2 = vmul.f32 %v1543_v1, %v919_v21  ;;  %vm926_vm0 = vweird.f32 %v1543_v1 }
0x1a55   :  { %vm927_vm14 = vmor %vm925_vm13, %vm926_vm0 }
0x1a56   :  { %v922_v3 = vsub.f32 1.0, %v921_v2 }
0x1a58   :  { %v923_v17 = vmul.f32 %v1543_v1, %v922_v3 }
0x1a5a   :  { %v924_v4 = vadd.f32 %v1543_v1, %v923_v17 }
0x1a5c   :  { %v928_v27 = vsel %vm927_vm14, %v1543_v1, %v924_v4 }
0x1a5d   :  { %v933_v9 = vsel %vm930_vm15, %v932_v7, %v928_v27 }
0x1a5e   :  { %v939_v12 = vmul.f32 %v937_v11, %v933_v9 }
0x1aa3   :  { %v942_v8 = vpop.permute.xlu2 %941 }
0x1aa4   :  { %v944_v10 = vmul.f32 %v942_v8, %v933_v9 }
0x1aa6   :  { %946 = vrot.lane.b32.xlu0 %v944_v10, %s1611_s6 }
0x1b18   :  { %v947_v14 = vpop.permute.xlu0 %946 }
0x1b19   :  { %v949_v15 = vadd.f32 %v947_v14, %v939_v12 }
0x1b1b   :  { %1544 = vtanh.f32 %v949_v15  ;;  %v999_v51 = vrot.slane %v949_v15, 6 }
0x1b21   :  { %v1545_v16 = vpop.eup %1544 }
0x1b22   :  { %952 = vrot.lane.b32.xlu1 %v1545_v16, %s1610_s3 }
0x1b94   :  { %v953_v20 = vpop.permute.xlu1 %952 }
0x1b95   :  { %v955_v22 = vmul.f32 %v953_v20, %v933_v9 }
0x1b97   :  { %v1219_v23 = vrot.slane %v955_v22, 3  ;;  %v1240_v24 = vrot.slane %v955_v22, 4  ;;  %v956_v26 = vpack.c.bf16 %v955_v22, %v955_v22 }
0x1b99   :  { %v1252_v13 = vsel %vm1251_vm2, %v1250_v46, %v1219_v23  ;;  %v1261_v28 = vsel %vm1251_vm2, %v1260_v57, %v1240_v24  ;;  %v958_v29 = vrot.slane %v956_v26, 3 }
0x1b9b   :  { %959 = vrot.lane.b32.xlu2 %v958_v29, %s1611_s6 }
0x1bf5   :  { %v960_v48 = vpop.permute.xlu2 %959 }
0x1bf6   :  { %1414 = vmatmul.msk.bf16.vlgmr.msrb.gmra.mxu0 %vm141_vm3, %v960_v48 }
0x1c73   :  { %v973_v30 = vpop.f32.mrf.mxu0 }
0x1c74   :  { %v977_v31 = vadd.f32 %v973_v30, %v1874_v49 }
0x1c76   :  { %1546 = vtanh.f32 %v977_v31  ;;  %v1415_v33 = vmul.f32 -1.442695, %v977_v31 }
0x1c78   :  { %1548 = vpow2.f32 %v1415_v33 }
0x1c7b   :  { %v975_v32 = vpop.f32.mrf.mxu0 }
0x1c7c   :  { %v1547_v19 = vpop.eup %1546 }
0x1c7d   :  { %1003 = vrot.lane.b32.xlu0 %v1547_v19, %s1610_s3 }
0x1c7e   :  { %v1549_v34 = vpop.eup %1548 }
0x1c7f   :  { %v981_v35 = vadd.f32 1.0, %v1549_v34 }
0x1c81   :  { %1550 = vrcp.f32 %v981_v35  ;;  %v993_v25 = vand.u32 2147483648, %v981_v35  ;;  %vm987_vm5 = vweird.f32 %v981_v35  ;;  %v991_v40 = vand.u32 2147483647, %v981_v35 }
0x1c83   :  { %v994_v42 = vor.u32 1.1754944e-38, %v993_v25  ;;  %vm992_vm8 = vcmp.eq.f32.partialorder %v991_v40, 8.507059e+37 }
0x1c87   :  { %v1551_v56 = vpop.eup %1550 }
0x1c88   :  { %v983_v36 = vmul.f32 %v1551_v56, %v981_v35  ;;  %vm988_vm4 = vweird.f32 %v1551_v56 }
0x1c89   :  { %vm989_vm6 = vmor %vm987_vm5, %vm988_vm4 }
0x1c8a   :  { %v984_v37 = vsub.f32 1.0, %v983_v36 }
0x1c8c   :  { %v985_v38 = vmul.f32 %v1551_v56, %v984_v37 }
0x1c8e   :  { %v986_v39 = vadd.f32 %v1551_v56, %v985_v38 }
0x1c90   :  { %v990_v41 = vsel %vm989_vm6, %v1551_v56, %v986_v39  ;;  %vm1257_vm6 = vcmask 1046528  }
0x1c91   :  { %v995_v44 = vsel %vm992_vm8, %v994_v42, %v990_v41 }
0x1c92   :  { %v1001_v52 = vmul.f32 %v999_v51, %v995_v44 }
0x1cef   :  { %v1004_v43 = vpop.permute.xlu0 %1003 }
0x1cf0   :  { %v1006_v50 = vmul.f32 %v1004_v43, %v995_v44 }
0x1cf2   :  { %1008 = vrot.lane.b32.xlu1 %v1006_v50, %s1611_s6 }
0x1d64   :  { %v1009_v53 = vpop.permute.xlu1 %1008 }
0x1d65   :  { %v1011_v54 = vadd.f32 %v1009_v53, %v1001_v52 }
0x1d67   :  { %1552 = vtanh.f32 %v1011_v54  ;;  %v1063_v15 = vrot.slane %v1011_v54, 6 }
0x1d6d   :  { %v1553_v55 = vpop.eup %1552 }
0x1d6e   :  { %1014 = vrot.lane.b32.xlu2 %v1553_v55, %s1610_s3 }
0x1dc8   :  { %v1015_v46 = vpop.permute.xlu2 %1014 }
0x1dc9   :  { %v1017_v57 = vmul.f32 %v1015_v46, %v995_v44 }
0x1dcb   :  { %v1222_v58 = vrot.slane %v1017_v57, 4  ;;  %v1242_v59 = vrot.slane %v1017_v57, 5  ;;  %v1018_v45 = vpack.c.bf16 %v1017_v57, %v1017_v57 }
0x1dcd   :  { %v1253_v60 = vsel %vm106_vm1, %v1252_v13, %v1222_v58  ;;  %v1262_v61 = vsel %vm106_vm1, %v1261_v28, %v1242_v59  ;;  %1020 = vrot.lane.b32.xlu0 %v1018_v45, %s1611_s6 }
0x1e3f   :  { %v1021_v18 = vpop.permute.xlu0 %1020 }
0x1e40   :  { %1416 = vmatmul.msk.bf16.vlgmr.msra.gmra.mxu1 %vm141_vm3, %v1021_v18 }
0x1ebd   :  { %v1034_v62 = vpop.f32.mrf.mxu1 }
0x1ebe   :  { %v1039_v63 = vrot.slane %v1034_v62, 6 }
0x1ec0   :  { %v1041_v47 = vadd.f32 %v1039_v63, %v1874_v49 }
0x1ec2   :  { %1554 = vtanh.f32 %v1041_v47  ;;  %v1417_v1 = vmul.f32 -1.442695, %v1041_v47 }
0x1ec4   :  { %1556 = vpow2.f32 %v1417_v1 }
0x1ec5   :  { %v1036_v0 = vpop.f32.mrf.mxu1 }
0x1ec8   :  { %v1555_v21 = vpop.eup %1554 }
0x1ec9   :  { %1067 = vrot.lane.b32.xlu1 %v1555_v21, %s1610_s3 }
0x1eca   :  { %v1557_v2 = vpop.eup %1556 }
0x1ecb   :  { %v1045_v3 = vadd.f32 1.0, %v1557_v2 }
0x1ecd   :  { %1558 = vrcp.f32 %v1045_v3  ;;  %v1057_v7 = vand.u32 2147483648, %v1045_v3  ;;  %vm1051_vm9 = vweird.f32 %v1045_v3  ;;  %v1055_v8 = vand.u32 2147483647, %v1045_v3 }
0x1ecf   :  { %v1058_v10 = vor.u32 1.1754944e-38, %v1057_v7  ;;  %vm1056_vm11 = vcmp.eq.f32.partialorder %v1055_v8, 8.507059e+37 }
0x1ed3   :  { %v1559_v17 = vpop.eup %1558 }
0x1ed4   :  { %v1047_v4 = vmul.f32 %v1559_v17, %v1045_v3  ;;  %vm1052_vm1 = vweird.f32 %v1559_v17 }
0x1ed5   :  { %vm1053_vm10 = vmor %vm1051_vm9, %vm1052_vm1 }
0x1ed6   :  { %v1048_v5 = vsub.f32 1.0, %v1047_v4 }
0x1ed8   :  { %v1049_v6 = vmul.f32 %v1559_v17, %v1048_v5 }
0x1eda   :  { %v1050_v27 = vadd.f32 %v1559_v17, %v1049_v6 }
0x1edc   :  { %v1054_v9 = vsel %vm1053_vm10, %v1559_v17, %v1050_v27 }
0x1edd   :  { %v1059_v12 = vsel %vm1056_vm11, %v1058_v10, %v1054_v9 }
0x1ede   :  { %v1065_v16 = vmul.f32 %v1063_v15, %v1059_v12 }
0x1f3b   :  { %v1068_v11 = vpop.permute.xlu1 %1067 }
0x1f3c   :  { %v1070_v14 = vmul.f32 %v1068_v11, %v1059_v12 }
0x1f3e   :  { %1072 = vrot.lane.b32.xlu2 %v1070_v14, %s1611_s6 }
0x1f98   :  { %v1073_v20 = vpop.permute.xlu2 %1072 }
0x1f99   :  { %v1075_v22 = vadd.f32 %v1073_v20, %v1065_v16 }
0x1f9b   :  { %1560 = vtanh.f32 %v1075_v22  ;;  %v1128_v55 = vrot.slane %v1075_v22, 6 }
0x1fa1   :  { %v1561_v23 = vpop.eup %1560 }
0x1fa2   :  { %1078 = vrot.lane.b32.xlu0 %v1561_v23, %s1610_s3 }
0x2014   :  { %v1079_v24 = vpop.permute.xlu0 %1078 }
0x2015   :  { %v1081_v26 = vmul.f32 %v1079_v24, %v1059_v12 }
0x2017   :  { %v1225_v13 = vrot.slane %v1081_v26, 5  ;;  %v1244_v28 = vrot.slane %v1081_v26, 6  ;;  %v1082_v29 = vpack.c.bf16 %v1081_v26, %v1081_v26 }
0x2019   :  { %v1084_v48 = vrot.slane %v1082_v29, 1  ;;  %v1255_v30 = vsel %vm1254_vm12, %v1253_v60, %v1225_v13  ;;  %v1263_v31 = vsel %vm1254_vm12, %v1262_v61, %v1244_v28  ;;  %v1440_v29 = vld [vmem:[%s1932_s10 + $0x8] sm:$0xff] }
0x201a   :  { %1299 = vmatpush.bf16.msra.mxu0 %v1440_v29 }
0x201b   :  { %1085 = vrot.lane.b32.xlu1 %v1084_v48, %s1611_s6  ;;  %v1439_v48 = vld [vmem:[%s1932_s10] sm:$0xff]  ;;  %s1612_s10 = smov [#allocation2]  }
0x201e   :  { %1300 = vmatpush.bf16.msra.mxu0 %v1439_v48 }
0x208d   :  { %v1086_v32 = vpop.permute.xlu1 %1085 }
0x208e   :  { %1418 = vmatmul.msk.bf16.vlgmr.msra.gmra.mxu2 %vm141_vm3, %v1086_v32 }
0x2111   :  { %v1099_v19 = vpop.f32.mrf.mxu2 }
0x2112   :  { %v1104_v33 = vrot.slane %v1099_v19, 4 }
0x2114   :  { %v1106_v34 = vadd.f32 %v1104_v33, %v1874_v49 }
0x2116   :  { %1562 = vtanh.f32 %v1106_v34  ;;  %v1419_v36 = vmul.f32 -1.442695, %v1106_v34 }
0x2118   :  { %1564 = vpow2.f32 %v1419_v36  ;;  %v1449_v36 = vld [vmem:[%s1933_s11] ss:$0 sm:$0xff]  ;;  %s1341_s11 = sshll.u32 %s1612_s10, 4  ;;  %s1342_s11 = int_to_ptr.vmem [resolvable:$true] %s1341_s11 }
0x2119   :  { %v1101_v35 = vpop.f32.mrf.mxu2 }
0x211c   :  { %v1563_v56 = vpop.eup %1562 }
0x211d   :  { %1132 = vrot.lane.b32.xlu2 %v1563_v56, %s1610_s3 }
0x211e   :  { %v1565_v37 = vpop.eup %1564 }
0x211f   :  { %v1110_v38 = vadd.f32 1.0, %v1565_v37 }
0x2121   :  { %1566 = vrcp.f32 %v1110_v38  ;;  %v1122_v43 = vand.u32 2147483648, %v1110_v38  ;;  %vm1116_vm13 = vweird.f32 %v1110_v38  ;;  %v1120_v44 = vand.u32 2147483647, %v1110_v38 }
0x2123   :  { %v1123_v51 = vor.u32 1.1754944e-38, %v1122_v43  ;;  %vm1121_vm15 = vcmp.eq.f32.partialorder %v1120_v44, 8.507059e+37 }
0x2127   :  { %v1567_v39 = vpop.eup %1566 }
0x2128   :  { %v1112_v25 = vmul.f32 %v1567_v39, %v1110_v38  ;;  %vm1117_vm0 = vweird.f32 %v1567_v39 }
0x2129   :  { %vm1118_vm14 = vmor %vm1116_vm13, %vm1117_vm0 }
0x212a   :  { %v1113_v40 = vsub.f32 1.0, %v1112_v25 }
0x212c   :  { %v1114_v41 = vmul.f32 %v1567_v39, %v1113_v40 }
0x212e   :  { %v1115_v42 = vadd.f32 %v1567_v39, %v1114_v41 }
0x2130   :  { %v1119_v50 = vsel %vm1118_vm14, %v1567_v39, %v1115_v42 }
0x2131   :  { %v1124_v53 = vsel %vm1121_vm15, %v1123_v51, %v1119_v50 }
0x2132   :  { %v1130_v46 = vmul.f32 %v1128_v55, %v1124_v53 }
0x2177   :  { %v1133_v52 = vpop.permute.xlu2 %1132 }
0x2178   :  { %v1135_v54 = vmul.f32 %v1133_v52, %v1124_v53 }
0x217a   :  { %1137 = vrot.lane.b32.xlu0 %v1135_v54, %s1611_s6 }
0x21ec   :  { %v1138_v57 = vpop.permute.xlu0 %1137 }
0x21ed   :  { %v1140_v58 = vadd.f32 %v1138_v57, %v1130_v46 }
0x21ef   :  { %1568 = vtanh.f32 %v1140_v58  ;;  %v1193_v23 = vrot.slane %v1140_v58, 6 }
0x21f5   :  { %v1569_v59 = vpop.eup %1568 }
0x21f6   :  { %1143 = vrot.lane.b32.xlu1 %v1569_v59, %s1610_s3 }
0x2268   :  { %v1144_v45 = vpop.permute.xlu1 %1143 }
0x2269   :  { %v1146_v60 = vmul.f32 %v1144_v45, %v1124_v53 }
0x226b   :  { %v1228_v61 = vrot.slane %v1146_v60, 6  ;;  %v1246_v18 = vrot.slane %v1146_v60, 7  ;;  %v1147_v62 = vpack.c.bf16 %v1146_v60, %v1146_v60 }
0x226d   :  { %v1149_v63 = vrot.slane %v1147_v62, 2  ;;  %v1256_v47 = vsel %vm649_vm7, %v1255_v30, %v1228_v61  ;;  %v1264_v0 = vsel %vm649_vm7, %v1263_v31, %v1246_v18 }
0x226f   :  { %1150 = vrot.lane.b32.xlu2 %v1149_v63, %s1611_s6 }
0x22c9   :  { %v1151_v21 = vpop.permute.xlu2 %1150 }
0x22ca   :  { %1420 = vmatmul.msk.bf16.vlgmr.msra.gmra.mxu3 %vm141_vm3, %v1151_v21 }
0x234d   :  { %v1164_v1 = vpop.f32.mrf.mxu3 }
0x234e   :  { %v1169_v2 = vrot.slane %v1164_v1, 2 }
0x2350   :  { %v1171_v3 = vadd.f32 %v1169_v2, %v1874_v49 }
0x2352   :  { %1570 = vtanh.f32 %v1171_v3  ;;  %v1421_v5 = vmul.f32 -1.442695, %v1171_v3 }
0x2354   :  { %1572 = vpow2.f32 %v1421_v5 }
0x2355   :  { %v1166_v17 = vpop.f32.mrf.mxu3 }
0x2358   :  { %v1571_v4 = vpop.eup %1570 }
0x2359   :  { %1197 = vrot.lane.b32.xlu0 %v1571_v4, %s1610_s3 }
0x235a   :  { %v1573_v6 = vpop.eup %1572 }
0x235b   :  { %v1175_v27 = vadd.f32 1.0, %v1573_v6 }
0x235d   :  { %1574 = vrcp.f32 %v1175_v27  ;;  %v1187_v12 = vand.u32 2147483648, %v1175_v27  ;;  %vm1181_vm2 = vweird.f32 %v1175_v27  ;;  %v1185_v14 = vand.u32 2147483647, %v1175_v27 }
0x235f   :  { %v1188_v15 = vor.u32 1.1754944e-38, %v1187_v12  ;;  %vm1186_vm5 = vcmp.eq.f32.partialorder %v1185_v14, 8.507059e+37 }
0x2363   :  { %v1575_v7 = vpop.eup %1574 }
0x2364   :  { %v1177_v8 = vmul.f32 %v1575_v7, %v1175_v27  ;;  %vm1182_vm7 = vweird.f32 %v1575_v7 }
0x2365   :  { %vm1183_vm4 = vmor %vm1181_vm2, %vm1182_vm7 }
0x2366   :  { %v1178_v9 = vsub.f32 1.0, %v1177_v8 }
0x2368   :  { %v1179_v10 = vmul.f32 %v1575_v7, %v1178_v9 }
0x236a   :  { %v1180_v11 = vadd.f32 %v1575_v7, %v1179_v10 }
0x236c   :  { %v1184_v49 = vsel %vm1183_vm4, %v1575_v7, %v1180_v11 }
0x236d   :  { %v1189_v20 = vsel %vm1186_vm5, %v1188_v15, %v1184_v49 }
0x236e   :  { %v1195_v24 = vmul.f32 %v1193_v23, %v1189_v20 }
0x23cb   :  { %v1198_v16 = vpop.permute.xlu0 %1197 }
0x23cc   :  { %v1200_v22 = vmul.f32 %v1198_v16, %v1189_v20 }
0x23ce   :  { %1202 = vrot.lane.b32.xlu1 %v1200_v22, %s1611_s6 }
0x2440   :  { %v1203_v26 = vpop.permute.xlu1 %1202 }
0x2441   :  { %v1205_v13 = vadd.f32 %v1203_v26, %v1195_v24 }
0x2443   :  { %1576 = vtanh.f32 %v1205_v13 }
0x2449   :  { %v1577_v28 = vpop.eup %1576 }
0x244a   :  { %1208 = vrot.lane.b32.xlu2 %v1577_v28, %s1610_s3 }
0x24a4   :  { %v1209_v30 = vpop.permute.xlu2 %1208 }
0x24a5   :  { %v1211_v31 = vmul.f32 %v1209_v30, %v1189_v20 }
0x24a7   :  { %v1231_v32 = vrot.slane %v1211_v31, 7  ;;  %v1265_v33 = vsel %vm1257_vm6, %v1264_v0, %v1211_v31 }
0x24a9   :  { %v1258_v19 = vsel %vm1257_vm6, %v1256_v47, %v1231_v32 }
0x24aa   :  { %v1266_v34 = vpack.c.bf16 %v1265_v33, %v1258_v19 }
0x24ac   :  { %1276 = vrot.lane.b32.xlu0 %v1266_v34, %s1611_s6 }
0x251e   :  { %v1277_v35 = vpop.permute.xlu0 %1276 }
0x251f   :  { %1430 = vmatmul.msk.bf16.vlgmr.msra.gmra.mxu0 %vm141_vm3, %v1277_v35 }
0x259c   :  { %v1302_v56 = vpop.f32.mrf.mxu0 }
0x259d   :  { %v1303_v37 = vadd.f32 %v1449_v36, %v1302_v56 }
0x259f   :  { %v1307_v25 = vsel %vm141_vm3, %v1303_v37, -inf }
0x25a4   :  { %v1304_v38 = vpop.f32.mrf.mxu0 }
0x25a5   :  { %v1305_v39 = vadd.f32 %v1449_v36, %v1304_v38 }
0x25a7   :  { %v1308_v40 = vsel %vm141_vm3, %v1305_v39, -inf }
0x25a8   :  { %v1309_v41 = vmax.f32 %v1307_v25, %v1308_v40 }
0x25aa   :  { %v1310_v42 = vsub.f32 %v1303_v37, %v1309_v41  ;;  %v1311_v43 = vsub.f32 %v1305_v39, %v1309_v41 }
0x25ac   :  { %v1312_v44 = vmul.f32 1.442695, %v1310_v42  ;;  %v1314_v50 = vmul.f32 1.442695, %v1311_v43 }
0x25ae   :  { %1578 = vpow2.f32 %v1312_v44 }
0x25af   :  { %1580 = vpow2.f32 %v1314_v50 }
0x25b4   :  { %v1579_v51 = vpop.eup %1578 }
0x25b5   :  { %v1581_v52 = vpop.eup %1580  ;;  %v1316_v53 = vsel %vm141_vm3, %v1579_v51, 0.0 }
0x25b6   :  { %v1317_v54 = vsel %vm141_vm3, %v1581_v52, 0.0 }
0x25b7   :  { %v1318_v55 = vadd.f32 %v1317_v54, %v1316_v53 }
0x25b9   :  { %1582 = vrcp.f32 %v1318_v55  ;;  %v1330_v59 = vand.u32 2147483648, %v1318_v55  ;;  %v1328_v60 = vand.u32 2147483647, %v1318_v55  ;;  %vm1324_vm1 = vweird.f32 %v1318_v55 }
0x25bb   :  { %v1331_v18 = vor.u32 1.1754944e-38, %v1330_v59  ;;  %vm1329_vm10 = vcmp.eq.f32.partialorder %v1328_v60, 8.507059e+37 }
0x25bf   :  { %v1583_v46 = vpop.eup %1582 }
0x25c0   :  { %v1320_v57 = vmul.f32 %v1583_v46, %v1318_v55  ;;  %vm1325_vm8 = vweird.f32 %v1583_v46 }
0x25c1   :  { %vm1326_vm9 = vmor %vm1324_vm1, %vm1325_vm8 }
0x25c2   :  { %v1321_v58 = vsub.f32 1.0, %v1320_v57 }
0x25c4   :  { %v1322_v45 = vmul.f32 %v1583_v46, %v1321_v58 }
0x25c6   :  { %v1323_v61 = vadd.f32 %v1583_v46, %v1322_v45 }
0x25c8   :  { %v1327_v62 = vsel %vm1326_vm9, %v1583_v46, %v1323_v61 }
0x25c9   :  { %v1332_v63 = vsel %vm1329_vm10, %v1331_v18, %v1327_v62 }
0x25ca   :  { %v1333_v47 = vmul.f32 %v1579_v51, %v1332_v63  ;;  %v1334_v0 = vmul.f32 %v1581_v52, %v1332_v63 }
0x25cc   :  { %1335 = vst.msk [vmem:[#allocation2] sm:$0xff] %vm141_vm3, %v1333_v47 }
0x25cd   :  { %1336 = vst.msk [vmem:[#allocation2 + $0x8] sm:$0xff] %vm141_vm3, %v1334_v0 }
0x25ce   :  { %1349 = dma.vmem_to_hbm [thread:$0]  %s1342_s11, 256, %s1344_s17, [#allocation3], %s1613_s18, %s1613_s18, %s1614_s19  }
0x25cf   :  { %1608 = dma.done.wait [#allocation3], 256  }
0x25d0   :  { %1609 = vsyncadd [#allocation3], 4294967040 }
0x25d1   :  { %1354 = vsyncpa [#allocation3], 1 }

</bundles_post_ra>
